<compile_context>
chip_gen: v6e
topology: v6e:2x2x1
jax: 0.10.0
libtpu: 0.0.40
codegen_flags: <defaults>
</compile_context>

<pallas_src>
import jax
import jax.numpy as jnp
from jax import lax
from jax.experimental import pallas as pl
from jax.experimental.pallas import tpu as pltpu


# ----------------------------------------------------------------------------
# Kernel
# ----------------------------------------------------------------------------
def _make_rae_kernel(B, L, D_in, H, D_out, compute_dtype):
    def kernel(x_ref, h0_ref,
               enc_wih_ref, enc_whh_ref, enc_gi_bias_ref, enc_bhh_n_ref,
               dec_wcat_ref, dec_bcat_ref,
               dense_w_ref, dense_b_ref,
               out_ref, hn_ref):
        f32 = jnp.float32
        cd = compute_dtype

        # ---------------- encoder: nn.GRU (batch_first) ----------------------
        # Input projection for ALL L timesteps in one MXU matmul, hoisted off
        # the serial chain.  x_ref is time-major (L*B, D_in).
        # enc_gi_bias = b_ih + [b_hh_r, b_hh_z, 0]  (r/z hh-bias pre-added).
        gi_all = (jnp.dot(x_ref[...].astype(cd), enc_wih_ref[...],
                          preferred_element_type=f32)
                  + enc_gi_bias_ref[...])                  # (L*B, 3H)
        gi_all = gi_all.reshape(L, B, 3 * H)               # one-time, off-chain

        enc_whh = enc_whh_ref[...]
        b_hh_n = enc_bhh_n_ref[...]                        # (1, H)

        h = h0_ref[...]                                    # (B, H) f32
        # Fully unrolled: ONE matmul per step on the dependency chain.
        for t in range(L):
            gi = gi_all[t]                                 # leading-axis index
            gh = jnp.dot(h.astype(cd), enc_whh, preferred_element_type=f32)
            r = jax.nn.sigmoid(gi[:, 0 * H:1 * H] + gh[:, 0 * H:1 * H])
            z = jax.nn.sigmoid(gi[:, 1 * H:2 * H] + gh[:, 1 * H:2 * H])
            n = jnp.tanh(gi[:, 2 * H:3 * H] + r * (gh[:, 2 * H:3 * H] + b_hh_n))
            h = (1.0 - z) * n + z * h
        hn_ref[...] = h

        # ---------------- decoder: GRUCell + Linear (fused) ------------------
        # dec_wcat = [dense_w_t @ dec_wih_t | dec_whh_t]           (H, 6H)
        # dec_bcat = [dense_b @ dec_wih_t + dec_bih | dec_bhh]     (1, 6H)
        # so every step is a SINGLE matmul on the serial chain.
        dec_w = dec_wcat_ref[...]
        dec_b = dec_bcat_ref[...]
        hs = []
        for t in range(L):
            gates = (jnp.dot(h.astype(cd), dec_w, preferred_element_type=f32)
                     + dec_b)
            gi, gh = gates[:, :3 * H], gates[:, 3 * H:]
            r = jax.nn.sigmoid(gi[:, 0 * H:1 * H] + gh[:, 0 * H:1 * H])
            z = jax.nn.sigmoid(gi[:, 1 * H:2 * H] + gh[:, 1 * H:2 * H])
            n = jnp.tanh(gi[:, 2 * H:3 * H] + r * gh[:, 2 * H:3 * H])  # b_hn in gh
            h = (1.0 - z) * n + z * h
            hs.append(h)                                   # stays in vregs

        # torch.flip(out, [1]) folded in by reversing the (Python) list; one
        # batched output dense + one bulk store, time-major (L*B, D_out).
        hs_flipped = jnp.concatenate(hs[::-1], axis=0)     # (L*B, H)
        out = (jnp.dot(hs_flipped.astype(cd), dense_w_ref[...],
                       preferred_element_type=f32)
               + dense_b_ref[...])
        out_ref[...] = out                                 # (L*B, D_out)

    return kernel


# ----------------------------------------------------------------------------
# One-time parameter preparation (exact algebraic identities of the PyTorch math)
# ----------------------------------------------------------------------------
def _fused_decoder_weights(params):
    """gi_t = dense(h_{t-1}) @ W_ih^T + b_ih
            = h_{t-1} @ (dense_w_t @ dec_wih_t) + (dense_b @ dec_wih_t + dec_bih)."""
    hp = lax.Precision.HIGHEST  # one-time tiny matmuls, keep full f32
    w_gi = jnp.dot(params["dense_w_t"], params["dec_wih_t"], precision=hp)
    b_gi = jnp.dot(params["dense_b"], params["dec_wih_t"], precision=hp) + params["dec_bih"]
    return w_gi, b_gi


def prepare_params(params, compute_dtype=jnp.float32):
    """Call ONCE (e.g. at init/load time), not per forward call."""
    H = params["enc_whh_t"].shape[0]
    w_gi, b_gi = _fused_decoder_weights(params)
    dec_wcat = jnp.concatenate([w_gi, params["dec_whh_t"]], axis=1)   # (H, 6H)
    dec_bcat = jnp.concatenate([b_gi, params["dec_bhh"]], axis=1)     # (1, 6H)
    # Pre-add r/z hh-bias into the (hoisted) input-projection bias.
    enc_gi_bias = params["enc_bih"].at[:, :2 * H].add(params["enc_bhh"][:, :2 * H])
    enc_bhh_n = params["enc_bhh"][:, 2 * H:]
    cd = compute_dtype
    return {
        "enc_wih": params["enc_wih_t"].astype(cd),
        "enc_whh": params["enc_whh_t"].astype(cd),
        "enc_gi_bias": enc_gi_bias.astype(jnp.float32),
        "enc_bhh_n": enc_bhh_n.astype(jnp.float32),
        "dec_wcat": dec_wcat.astype(cd),
        "dec_bcat": dec_bcat.astype(jnp.float32),
        "dense_w": params["dense_w_t"].astype(cd),
        "dense_b": params["dense_b"].astype(jnp.float32),
    }


# ----------------------------------------------------------------------------
# Wrapper
# ----------------------------------------------------------------------------
@jax.jit
def recurrent_ae_forward(x, hidden_state, prepared):
    """x: (B, L, D_in) f32, hidden_state: (1, B, H) f32, prepared = prepare_params(...).
    Returns (out, h_n): out (B, L, D_out) already time-flipped, h_n (1, B, H)."""
    B, L, D_in = x.shape
    H = prepared["enc_whh"].shape[0]
    D_out = prepared["dense_w"].shape[1]
    compute_dtype = prepared["enc_wih"].dtype

    # Time-major, flattened input (one-time tiny transpose, off the chain).
    x_tm = jnp.transpose(x.astype(jnp.float32), (1, 0, 2)).reshape(L * B, D_in)
    h0 = hidden_state.reshape(B, H).astype(jnp.float32)

    kernel = _make_rae_kernel(B, L, D_in, H, D_out, compute_dtype)
    vmem = pl.BlockSpec(memory_space=pltpu.MemorySpace.VMEM)

    out_flat, h_n = pl.pallas_call(
        kernel,
        out_shape=(
            jax.ShapeDtypeStruct((L * B, D_out), jnp.float32),
            jax.ShapeDtypeStruct((B, H), jnp.float32),
        ),
        in_specs=[vmem] * 10,
        out_specs=(vmem, vmem),
    )(
        x_tm, h0,
        prepared["enc_wih"], prepared["enc_whh"],
        prepared["enc_gi_bias"], prepared["enc_bhh_n"],
        prepared["dec_wcat"], prepared["dec_bcat"],
        prepared["dense_w"], prepared["dense_b"],
    )
    # out_flat row t*B + b  ==  out[b, t]  (flip already applied in-kernel).
    out = jnp.transpose(out_flat.reshape(L, B, D_out), (1, 0, 2))
    return out, h_n.reshape(1, B, H)


# ----------------------------------------------------------------------------
# Deterministic parameter init (mirrors PyTorch defaults / get_and_init_FC_layer)
# ----------------------------------------------------------------------------
def init_params(key, input_size, hidden_size, output_size):
    H, D_in, D_out = hidden_size, input_size, output_size
    keys = jax.random.split(key, 9)
    k = 1.0 / jnp.sqrt(H)  # PyTorch GRU / GRUCell default: U(-1/sqrt(H), 1/sqrt(H))

    def u(kk, shape):
        return jax.random.uniform(kk, shape, jnp.float32, -k, k)

    enc_wih = u(keys[0], (3 * H, D_in))
    enc_whh = u(keys[1], (3 * H, H))
    enc_bih = u(keys[2], (3 * H,))
    enc_bhh = u(keys[3], (3 * H,))

    dec_wih = u(keys[4], (3 * H, D_out))
    dec_whh = u(keys[5], (3 * H, H))
    dec_bih = u(keys[6], (3 * H,))
    dec_bhh = u(keys[7], (3 * H,))

    # dense: Linear(H, D_out), xavier_uniform with gain=sqrt(2) ('relu'), bias=0
    gain = jnp.sqrt(2.0)
    bound = gain * jnp.sqrt(6.0 / (H + D_out))
    dense_w = jax.random.uniform(keys[8], (D_out, H), jnp.float32, -bound, bound)
    dense_b = jnp.zeros((D_out,), jnp.float32)

    return {
        "enc_wih_t": enc_wih.T, "enc_whh_t": enc_whh.T,
        "enc_bih": enc_bih.reshape(1, 3 * H), "enc_bhh": enc_bhh.reshape(1, 3 * H),
        "dec_wih_t": dec_wih.T, "dec_whh_t": dec_whh.T,
        "dec_bih": dec_bih.reshape(1, 3 * H), "dec_bhh": dec_bhh.reshape(1, 3 * H),
        "dense_w_t": dense_w.T, "dense_b": dense_b.reshape(1, D_out),
    }


# ----------------------------------------------------------------------------
# Pure-JAX reference.
#   kernel_order=True  : same op-order as the kernel (pre-added encoder r/z
#                        hh-bias, fused decoder weights) -> strict comparison.
#   kernel_order=False : faithful PyTorch op-order.
# Both are exact algebraic identities of the PyTorch math.
# ----------------------------------------------------------------------------
def _ref_forward(x, hidden_state, params, H, kernel_order=False):
    B, L, _ = x.shape

    def gru(gi, gh, h, b_hn=None):
        r = jax.nn.sigmoid(gi[:, :H] + gh[:, :H])
        z = jax.nn.sigmoid(gi[:, H:2 * H] + gh[:, H:2 * H])
        if b_hn is None:
            n = jnp.tanh(gi[:, 2 * H:] + r * gh[:, 2 * H:])
        else:
            n = jnp.tanh(gi[:, 2 * H:] + r * (gh[:, 2 * H:] + b_hn))
        return (1.0 - z) * n + z * h

    h = hidden_state.reshape(B, H)
    if kernel_order:
        enc_gi_bias = params["enc_bih"].at[:, :2 * H].add(params["enc_bhh"][:, :2 * H])
        b_hn = params["enc_bhh"][:, 2 * H:]
        for t in range(L):
            gi = x[:, t] @ params["enc_wih_t"] + enc_gi_bias
            gh = h @ params["enc_whh_t"]
            h = gru(gi, gh, h, b_hn)
    else:
        for t in range(L):
            gi = x[:, t] @ params["enc_wih_t"] + params["enc_bih"]
            gh = h @ params["enc_whh_t"] + params["enc_bhh"]
            h = gru(gi, gh, h)
    h_n = h

    dense = lambda hh: hh @ params["dense_w_t"] + params["dense_b"]
    fused = _fused_decoder_weights(params) if kernel_order else None
    x_i = dense(h_n)
    outs = []
    for _ in range(L):
        if fused is None:
            gi = x_i @ params["dec_wih_t"] + params["dec_bih"]
        else:
            w_gi, b_gi = fused
            gi = h @ w_gi + b_gi
        gh = h @ params["dec_whh_t"] + params["dec_bhh"]
        h = gru(gi, gh, h)
        x_i = dense(h)
        outs.append(x_i)
    out = jnp.stack(outs, axis=1)[:, ::-1, :]    # torch.flip(out, [1])
    return out, h_n.reshape(1, B, H)


# ----------------------------------------------------------------------------
if __name__ == "__main__":
    B, L = 2, 8
    INPUT_SIZE, HIDDEN_SIZE, OUTPUT_SIZE = 12, 32, 16

    key = jax.random.PRNGKey(0)
    k_x, k_p = jax.random.split(key)
    x = jax.random.normal(k_x, (B, L, INPUT_SIZE), jnp.float32)
    hidden_state = jnp.zeros((1, B, HIDDEN_SIZE), jnp.float32)
    params = init_params(k_p, INPUT_SIZE, HIDDEN_SIZE, OUTPUT_SIZE)

    # ---- f32 path (default): strict correctness -----------------------------
    prepared_f32 = prepare_params(params, jnp.float32)   # ONCE, not per call
    out, h_n = recurrent_ae_forward(x, hidden_state, prepared_f32)
    out = jax.block_until_ready(out)
    h_n = jax.block_until_ready(h_n)
    assert out.shape == (B, L, OUTPUT_SIZE) and h_n.shape == (1, B, HIDDEN_SIZE)

    # (1) Strict check vs. a reference with the SAME op-order as the kernel.
    ref_out_k, ref_hn_k = _ref_forward(x, hidden_state, params, HIDDEN_SIZE,
                                       kernel_order=True)
    assert jnp.allclose(out, ref_out_k, atol=1e-5, rtol=1e-5)
    assert jnp.allclose(h_n, ref_hn_k, atol=1e-5, rtol=1e-5)

    # (2) PyTorch-faithful op-order: weight/bias fusion is an exact algebraic
    #     identity; looser tolerance only covers the backend's default f32
    #     matmul precision under the reassociated op-order.
    ref_out_u, ref_hn_u = _ref_forward(x, hidden_state, params, HIDDEN_SIZE,
                                       kernel_order=False)
    assert jnp.allclose(h_n, ref_hn_u, atol=1e-5, rtol=1e-5)
    assert jnp.allclose(out, ref_out_u, atol=5e-3, rtol=5e-3)

    # ---- optional bf16-weight path (v6e/v7x MXU single-pass); f32 gate math -
    prepared_bf16 = prepare_params(params, jnp.bfloat16)
    out_b, hn_b = recurrent_ae_forward(x, hidden_state, prepared_bf16)
    out_b = jax.block_until_ready(out_b)
    assert jnp.allclose(out_b, out, atol=5e-2, rtol=5e-2)
    assert jnp.allclose(hn_b, h_n, atol=5e-2, rtol=5e-2)

    print("KERNEL_OK")
</pallas_src>

<mosaic_0001>
module attributes {stable_mosaic.version = 11 : i64} {
  func.func @kernel(%arg0: memref<16x12xf32, #tpu.memory_space<vmem>>, %arg1: memref<2x32xf32, #tpu.memory_space<vmem>>, %arg2: memref<12x96xf32, #tpu.memory_space<vmem>>, %arg3: memref<32x96xf32, #tpu.memory_space<vmem>>, %arg4: memref<1x96xf32, #tpu.memory_space<vmem>>, %arg5: memref<1x32xf32, #tpu.memory_space<vmem>>, %arg6: memref<32x192xf32, #tpu.memory_space<vmem>>, %arg7: memref<1x192xf32, #tpu.memory_space<vmem>>, %arg8: memref<32x16xf32, #tpu.memory_space<vmem>>, %arg9: memref<1x16xf32, #tpu.memory_space<vmem>>, %arg10: memref<16x16xf32, #tpu.memory_space<vmem>>, %arg11: memref<2x32xf32, #tpu.memory_space<vmem>>) attributes {dimension_semantics = [], scalar_prefetch = 0 : i64, scratch_operands = 0 : i64, tpu.core_type = #tpu.core_type<tc>} {
    %c0 = arith.constant 0 : index
    %c0_0 = arith.constant 0 : index
    %0 = vector.load %arg0[%c0, %c0_0] : memref<16x12xf32, #tpu.memory_space<vmem>>, vector<16x12xf32>
    %c0_1 = arith.constant 0 : index
    %c0_2 = arith.constant 0 : index
    %1 = vector.load %arg2[%c0_1, %c0_2] : memref<12x96xf32, #tpu.memory_space<vmem>>, vector<12x96xf32>
    %cst = arith.constant dense<0.000000e+00> : vector<16x96xf32>
    %2 = tpu.matmul %0, %1, %cst {dimension_numbers = #tpu.dot_dimension_numbers<[1], [0], [0], [1], [0, 0, 1, 1], [], []>} : vector<16x12xf32>, vector<12x96xf32>, vector<16x96xf32> -> vector<16x96xf32>
    %c0_3 = arith.constant 0 : index
    %c0_4 = arith.constant 0 : index
    %3 = vector.load %arg4[%c0_3, %c0_4] : memref<1x96xf32, #tpu.memory_space<vmem>>, vector<1x96xf32>
    %4 = vector.broadcast %3 : vector<1x96xf32> to vector<16x96xf32>
    %5 = arith.addf %2, %4 : vector<16x96xf32>
    %6 = vector.shape_cast %5 : vector<16x96xf32> to vector<8x2x96xf32>
    %c0_5 = arith.constant 0 : index
    %c0_6 = arith.constant 0 : index
    %7 = vector.load %arg3[%c0_5, %c0_6] : memref<32x96xf32, #tpu.memory_space<vmem>>, vector<32x96xf32>
    %c0_7 = arith.constant 0 : index
    %c0_8 = arith.constant 0 : index
    %8 = vector.load %arg5[%c0_7, %c0_8] : memref<1x32xf32, #tpu.memory_space<vmem>>, vector<1x32xf32>
    %c0_9 = arith.constant 0 : index
    %c0_10 = arith.constant 0 : index
    %9 = vector.load %arg1[%c0_9, %c0_10] : memref<2x32xf32, #tpu.memory_space<vmem>>, vector<2x32xf32>
    %10 = vector.extract_strided_slice %6 {offsets = [0, 0, 0], sizes = [1, 2, 96], strides = [1, 1, 1]} : vector<8x2x96xf32> to vector<1x2x96xf32>
    %11 = vector.shape_cast %10 : vector<1x2x96xf32> to vector<2x96xf32>
    %cst_11 = arith.constant dense<0.000000e+00> : vector<2x96xf32>
    %12 = tpu.matmul %9, %7, %cst_11 {dimension_numbers = #tpu.dot_dimension_numbers<[1], [0], [0], [1], [0, 0, 1, 1], [], []>} : vector<2x32xf32>, vector<32x96xf32>, vector<2x96xf32> -> vector<2x96xf32>
    %13 = vector.extract_strided_slice %11 {offsets = [0, 0], sizes = [2, 32], strides = [1, 1]} : vector<2x96xf32> to vector<2x32xf32>
    %14 = vector.extract_strided_slice %12 {offsets = [0, 0], sizes = [2, 32], strides = [1, 1]} : vector<2x96xf32> to vector<2x32xf32>
    %15 = arith.addf %13, %14 : vector<2x32xf32>
    %16 = arith.negf %15 : vector<2x32xf32>
    %17 = math.exp %16 : vector<2x32xf32>
    %cst_12 = arith.constant 1.000000e+00 : f32
    %18 = vector.broadcast %cst_12 : f32 to vector<2x32xf32>
    %19 = arith.addf %18, %17 : vector<2x32xf32>
    %20 = arith.divf %18, %19 : vector<2x32xf32>
    %21 = vector.extract_strided_slice %11 {offsets = [0, 32], sizes = [2, 32], strides = [1, 1]} : vector<2x96xf32> to vector<2x32xf32>
    %22 = vector.extract_strided_slice %12 {offsets = [0, 32], sizes = [2, 32], strides = [1, 1]} : vector<2x96xf32> to vector<2x32xf32>
    %23 = arith.addf %21, %22 : vector<2x32xf32>
    %24 = arith.negf %23 : vector<2x32xf32>
    %25 = math.exp %24 : vector<2x32xf32>
    %cst_13 = arith.constant 1.000000e+00 : f32
    %26 = vector.broadcast %cst_13 : f32 to vector<2x32xf32>
    %27 = arith.addf %26, %25 : vector<2x32xf32>
    %28 = arith.divf %26, %27 : vector<2x32xf32>
    %29 = vector.extract_strided_slice %11 {offsets = [0, 64], sizes = [2, 32], strides = [1, 1]} : vector<2x96xf32> to vector<2x32xf32>
    %30 = vector.extract_strided_slice %12 {offsets = [0, 64], sizes = [2, 32], strides = [1, 1]} : vector<2x96xf32> to vector<2x32xf32>
    %31 = vector.broadcast %8 : vector<1x32xf32> to vector<2x32xf32>
    %32 = arith.addf %30, %31 : vector<2x32xf32>
    %33 = arith.mulf %20, %32 : vector<2x32xf32>
    %34 = arith.addf %29, %33 : vector<2x32xf32>
    %35 = math.tanh %34 : vector<2x32xf32>
    %cst_14 = arith.constant 1.000000e+00 : f32
    %36 = vector.broadcast %cst_14 : f32 to vector<2x32xf32>
    %37 = arith.subf %36, %28 : vector<2x32xf32>
    %38 = arith.mulf %37, %35 : vector<2x32xf32>
    %39 = arith.mulf %28, %9 : vector<2x32xf32>
    %40 = arith.addf %38, %39 : vector<2x32xf32>
    %41 = vector.extract_strided_slice %6 {offsets = [1, 0, 0], sizes = [1, 2, 96], strides = [1, 1, 1]} : vector<8x2x96xf32> to vector<1x2x96xf32>
    %42 = vector.shape_cast %41 : vector<1x2x96xf32> to vector<2x96xf32>
    %cst_15 = arith.constant dense<0.000000e+00> : vector<2x96xf32>
    %43 = tpu.matmul %40, %7, %cst_15 {dimension_numbers = #tpu.dot_dimension_numbers<[1], [0], [0], [1], [0, 0, 1, 1], [], []>} : vector<2x32xf32>, vector<32x96xf32>, vector<2x96xf32> -> vector<2x96xf32>
    %44 = vector.extract_strided_slice %42 {offsets = [0, 0], sizes = [2, 32], strides = [1, 1]} : vector<2x96xf32> to vector<2x32xf32>
    %45 = vector.extract_strided_slice %43 {offsets = [0, 0], sizes = [2, 32], strides = [1, 1]} : vector<2x96xf32> to vector<2x32xf32>
    %46 = arith.addf %44, %45 : vector<2x32xf32>
    %47 = arith.negf %46 : vector<2x32xf32>
    %48 = math.exp %47 : vector<2x32xf32>
    %cst_16 = arith.constant 1.000000e+00 : f32
    %49 = vector.broadcast %cst_16 : f32 to vector<2x32xf32>
    %50 = arith.addf %49, %48 : vector<2x32xf32>
    %51 = arith.divf %49, %50 : vector<2x32xf32>
    %52 = vector.extract_strided_slice %42 {offsets = [0, 32], sizes = [2, 32], strides = [1, 1]} : vector<2x96xf32> to vector<2x32xf32>
    %53 = vector.extract_strided_slice %43 {offsets = [0, 32], sizes = [2, 32], strides = [1, 1]} : vector<2x96xf32> to vector<2x32xf32>
    %54 = arith.addf %52, %53 : vector<2x32xf32>
    %55 = arith.negf %54 : vector<2x32xf32>
    %56 = math.exp %55 : vector<2x32xf32>
    %cst_17 = arith.constant 1.000000e+00 : f32
    %57 = vector.broadcast %cst_17 : f32 to vector<2x32xf32>
    %58 = arith.addf %57, %56 : vector<2x32xf32>
    %59 = arith.divf %57, %58 : vector<2x32xf32>
    %60 = vector.extract_strided_slice %42 {offsets = [0, 64], sizes = [2, 32], strides = [1, 1]} : vector<2x96xf32> to vector<2x32xf32>
    %61 = vector.extract_strided_slice %43 {offsets = [0, 64], sizes = [2, 32], strides = [1, 1]} : vector<2x96xf32> to vector<2x32xf32>
    %62 = vector.broadcast %8 : vector<1x32xf32> to vector<2x32xf32>
    %63 = arith.addf %61, %62 : vector<2x32xf32>
    %64 = arith.mulf %51, %63 : vector<2x32xf32>
    %65 = arith.addf %60, %64 : vector<2x32xf32>
    %66 = math.tanh %65 : vector<2x32xf32>
    %cst_18 = arith.constant 1.000000e+00 : f32
    %67 = vector.broadcast %cst_18 : f32 to vector<2x32xf32>
    %68 = arith.subf %67, %59 : vector<2x32xf32>
    %69 = arith.mulf %68, %66 : vector<2x32xf32>
    %70 = arith.mulf %59, %40 : vector<2x32xf32>
    %71 = arith.addf %69, %70 : vector<2x32xf32>
    %72 = vector.extract_strided_slice %6 {offsets = [2, 0, 0], sizes = [1, 2, 96], strides = [1, 1, 1]} : vector<8x2x96xf32> to vector<1x2x96xf32>
    %73 = vector.shape_cast %72 : vector<1x2x96xf32> to vector<2x96xf32>
    %cst_19 = arith.constant dense<0.000000e+00> : vector<2x96xf32>
    %74 = tpu.matmul %71, %7, %cst_19 {dimension_numbers = #tpu.dot_dimension_numbers<[1], [0], [0], [1], [0, 0, 1, 1], [], []>} : vector<2x32xf32>, vector<32x96xf32>, vector<2x96xf32> -> vector<2x96xf32>
    %75 = vector.extract_strided_slice %73 {offsets = [0, 0], sizes = [2, 32], strides = [1, 1]} : vector<2x96xf32> to vector<2x32xf32>
    %76 = vector.extract_strided_slice %74 {offsets = [0, 0], sizes = [2, 32], strides = [1, 1]} : vector<2x96xf32> to vector<2x32xf32>
    %77 = arith.addf %75, %76 : vector<2x32xf32>
    %78 = arith.negf %77 : vector<2x32xf32>
    %79 = math.exp %78 : vector<2x32xf32>
    %cst_20 = arith.constant 1.000000e+00 : f32
    %80 = vector.broadcast %cst_20 : f32 to vector<2x32xf32>
    %81 = arith.addf %80, %79 : vector<2x32xf32>
    %82 = arith.divf %80, %81 : vector<2x32xf32>
    %83 = vector.extract_strided_slice %73 {offsets = [0, 32], sizes = [2, 32], strides = [1, 1]} : vector<2x96xf32> to vector<2x32xf32>
    %84 = vector.extract_strided_slice %74 {offsets = [0, 32], sizes = [2, 32], strides = [1, 1]} : vector<2x96xf32> to vector<2x32xf32>
    %85 = arith.addf %83, %84 : vector<2x32xf32>
    %86 = arith.negf %85 : vector<2x32xf32>
    %87 = math.exp %86 : vector<2x32xf32>
    %cst_21 = arith.constant 1.000000e+00 : f32
    %88 = vector.broadcast %cst_21 : f32 to vector<2x32xf32>
    %89 = arith.addf %88, %87 : vector<2x32xf32>
    %90 = arith.divf %88, %89 : vector<2x32xf32>
    %91 = vector.extract_strided_slice %73 {offsets = [0, 64], sizes = [2, 32], strides = [1, 1]} : vector<2x96xf32> to vector<2x32xf32>
    %92 = vector.extract_strided_slice %74 {offsets = [0, 64], sizes = [2, 32], strides = [1, 1]} : vector<2x96xf32> to vector<2x32xf32>
    %93 = vector.broadcast %8 : vector<1x32xf32> to vector<2x32xf32>
    %94 = arith.addf %92, %93 : vector<2x32xf32>
    %95 = arith.mulf %82, %94 : vector<2x32xf32>
    %96 = arith.addf %91, %95 : vector<2x32xf32>
    %97 = math.tanh %96 : vector<2x32xf32>
    %cst_22 = arith.constant 1.000000e+00 : f32
    %98 = vector.broadcast %cst_22 : f32 to vector<2x32xf32>
    %99 = arith.subf %98, %90 : vector<2x32xf32>
    %100 = arith.mulf %99, %97 : vector<2x32xf32>
    %101 = arith.mulf %90, %71 : vector<2x32xf32>
    %102 = arith.addf %100, %101 : vector<2x32xf32>
    %103 = vector.extract_strided_slice %6 {offsets = [3, 0, 0], sizes = [1, 2, 96], strides = [1, 1, 1]} : vector<8x2x96xf32> to vector<1x2x96xf32>
    %104 = vector.shape_cast %103 : vector<1x2x96xf32> to vector<2x96xf32>
    %cst_23 = arith.constant dense<0.000000e+00> : vector<2x96xf32>
    %105 = tpu.matmul %102, %7, %cst_23 {dimension_numbers = #tpu.dot_dimension_numbers<[1], [0], [0], [1], [0, 0, 1, 1], [], []>} : vector<2x32xf32>, vector<32x96xf32>, vector<2x96xf32> -> vector<2x96xf32>
    %106 = vector.extract_strided_slice %104 {offsets = [0, 0], sizes = [2, 32], strides = [1, 1]} : vector<2x96xf32> to vector<2x32xf32>
    %107 = vector.extract_strided_slice %105 {offsets = [0, 0], sizes = [2, 32], strides = [1, 1]} : vector<2x96xf32> to vector<2x32xf32>
    %108 = arith.addf %106, %107 : vector<2x32xf32>
    %109 = arith.negf %108 : vector<2x32xf32>
    %110 = math.exp %109 : vector<2x32xf32>
    %cst_24 = arith.constant 1.000000e+00 : f32
    %111 = vector.broadcast %cst_24 : f32 to vector<2x32xf32>
    %112 = arith.addf %111, %110 : vector<2x32xf32>
    %113 = arith.divf %111, %112 : vector<2x32xf32>
    %114 = vector.extract_strided_slice %104 {offsets = [0, 32], sizes = [2, 32], strides = [1, 1]} : vector<2x96xf32> to vector<2x32xf32>
    %115 = vector.extract_strided_slice %105 {offsets = [0, 32], sizes = [2, 32], strides = [1, 1]} : vector<2x96xf32> to vector<2x32xf32>
    %116 = arith.addf %114, %115 : vector<2x32xf32>
    %117 = arith.negf %116 : vector<2x32xf32>
    %118 = math.exp %117 : vector<2x32xf32>
    %cst_25 = arith.constant 1.000000e+00 : f32
    %119 = vector.broadcast %cst_25 : f32 to vector<2x32xf32>
    %120 = arith.addf %119, %118 : vector<2x32xf32>
    %121 = arith.divf %119, %120 : vector<2x32xf32>
    %122 = vector.extract_strided_slice %104 {offsets = [0, 64], sizes = [2, 32], strides = [1, 1]} : vector<2x96xf32> to vector<2x32xf32>
    %123 = vector.extract_strided_slice %105 {offsets = [0, 64], sizes = [2, 32], strides = [1, 1]} : vector<2x96xf32> to vector<2x32xf32>
    %124 = vector.broadcast %8 : vector<1x32xf32> to vector<2x32xf32>
    %125 = arith.addf %123, %124 : vector<2x32xf32>
    %126 = arith.mulf %113, %125 : vector<2x32xf32>
    %127 = arith.addf %122, %126 : vector<2x32xf32>
    %128 = math.tanh %127 : vector<2x32xf32>
    %cst_26 = arith.constant 1.000000e+00 : f32
    %129 = vector.broadcast %cst_26 : f32 to vector<2x32xf32>
    %130 = arith.subf %129, %121 : vector<2x32xf32>
    %131 = arith.mulf %130, %128 : vector<2x32xf32>
    %132 = arith.mulf %121, %102 : vector<2x32xf32>
    %133 = arith.addf %131, %132 : vector<2x32xf32>
    %134 = vector.extract_strided_slice %6 {offsets = [4, 0, 0], sizes = [1, 2, 96], strides = [1, 1, 1]} : vector<8x2x96xf32> to vector<1x2x96xf32>
    %135 = vector.shape_cast %134 : vector<1x2x96xf32> to vector<2x96xf32>
    %cst_27 = arith.constant dense<0.000000e+00> : vector<2x96xf32>
    %136 = tpu.matmul %133, %7, %cst_27 {dimension_numbers = #tpu.dot_dimension_numbers<[1], [0], [0], [1], [0, 0, 1, 1], [], []>} : vector<2x32xf32>, vector<32x96xf32>, vector<2x96xf32> -> vector<2x96xf32>
    %137 = vector.extract_strided_slice %135 {offsets = [0, 0], sizes = [2, 32], strides = [1, 1]} : vector<2x96xf32> to vector<2x32xf32>
    %138 = vector.extract_strided_slice %136 {offsets = [0, 0], sizes = [2, 32], strides = [1, 1]} : vector<2x96xf32> to vector<2x32xf32>
    %139 = arith.addf %137, %138 : vector<2x32xf32>
    %140 = arith.negf %139 : vector<2x32xf32>
    %141 = math.exp %140 : vector<2x32xf32>
    %cst_28 = arith.constant 1.000000e+00 : f32
    %142 = vector.broadcast %cst_28 : f32 to vector<2x32xf32>
    %143 = arith.addf %142, %141 : vector<2x32xf32>
    %144 = arith.divf %142, %143 : vector<2x32xf32>
    %145 = vector.extract_strided_slice %135 {offsets = [0, 32], sizes = [2, 32], strides = [1, 1]} : vector<2x96xf32> to vector<2x32xf32>
    %146 = vector.extract_strided_slice %136 {offsets = [0, 32], sizes = [2, 32], strides = [1, 1]} : vector<2x96xf32> to vector<2x32xf32>
    %147 = arith.addf %145, %146 : vector<2x32xf32>
    %148 = arith.negf %147 : vector<2x32xf32>
    %149 = math.exp %148 : vector<2x32xf32>
    %cst_29 = arith.constant 1.000000e+00 : f32
    %150 = vector.broadcast %cst_29 : f32 to vector<2x32xf32>
    %151 = arith.addf %150, %149 : vector<2x32xf32>
    %152 = arith.divf %150, %151 : vector<2x32xf32>
    %153 = vector.extract_strided_slice %135 {offsets = [0, 64], sizes = [2, 32], strides = [1, 1]} : vector<2x96xf32> to vector<2x32xf32>
    %154 = vector.extract_strided_slice %136 {offsets = [0, 64], sizes = [2, 32], strides = [1, 1]} : vector<2x96xf32> to vector<2x32xf32>
    %155 = vector.broadcast %8 : vector<1x32xf32> to vector<2x32xf32>
    %156 = arith.addf %154, %155 : vector<2x32xf32>
    %157 = arith.mulf %144, %156 : vector<2x32xf32>
    %158 = arith.addf %153, %157 : vector<2x32xf32>
    %159 = math.tanh %158 : vector<2x32xf32>
    %cst_30 = arith.constant 1.000000e+00 : f32
    %160 = vector.broadcast %cst_30 : f32 to vector<2x32xf32>
    %161 = arith.subf %160, %152 : vector<2x32xf32>
    %162 = arith.mulf %161, %159 : vector<2x32xf32>
    %163 = arith.mulf %152, %133 : vector<2x32xf32>
    %164 = arith.addf %162, %163 : vector<2x32xf32>
    %165 = vector.extract_strided_slice %6 {offsets = [5, 0, 0], sizes = [1, 2, 96], strides = [1, 1, 1]} : vector<8x2x96xf32> to vector<1x2x96xf32>
    %166 = vector.shape_cast %165 : vector<1x2x96xf32> to vector<2x96xf32>
    %cst_31 = arith.constant dense<0.000000e+00> : vector<2x96xf32>
    %167 = tpu.matmul %164, %7, %cst_31 {dimension_numbers = #tpu.dot_dimension_numbers<[1], [0], [0], [1], [0, 0, 1, 1], [], []>} : vector<2x32xf32>, vector<32x96xf32>, vector<2x96xf32> -> vector<2x96xf32>
    %168 = vector.extract_strided_slice %166 {offsets = [0, 0], sizes = [2, 32], strides = [1, 1]} : vector<2x96xf32> to vector<2x32xf32>
    %169 = vector.extract_strided_slice %167 {offsets = [0, 0], sizes = [2, 32], strides = [1, 1]} : vector<2x96xf32> to vector<2x32xf32>
    %170 = arith.addf %168, %169 : vector<2x32xf32>
    %171 = arith.negf %170 : vector<2x32xf32>
    %172 = math.exp %171 : vector<2x32xf32>
    %cst_32 = arith.constant 1.000000e+00 : f32
    %173 = vector.broadcast %cst_32 : f32 to vector<2x32xf32>
    %174 = arith.addf %173, %172 : vector<2x32xf32>
    %175 = arith.divf %173, %174 : vector<2x32xf32>
    %176 = vector.extract_strided_slice %166 {offsets = [0, 32], sizes = [2, 32], strides = [1, 1]} : vector<2x96xf32> to vector<2x32xf32>
    %177 = vector.extract_strided_slice %167 {offsets = [0, 32], sizes = [2, 32], strides = [1, 1]} : vector<2x96xf32> to vector<2x32xf32>
    %178 = arith.addf %176, %177 : vector<2x32xf32>
    %179 = arith.negf %178 : vector<2x32xf32>
    %180 = math.exp %179 : vector<2x32xf32>
    %cst_33 = arith.constant 1.000000e+00 : f32
    %181 = vector.broadcast %cst_33 : f32 to vector<2x32xf32>
    %182 = arith.addf %181, %180 : vector<2x32xf32>
    %183 = arith.divf %181, %182 : vector<2x32xf32>
    %184 = vector.extract_strided_slice %166 {offsets = [0, 64], sizes = [2, 32], strides = [1, 1]} : vector<2x96xf32> to vector<2x32xf32>
    %185 = vector.extract_strided_slice %167 {offsets = [0, 64], sizes = [2, 32], strides = [1, 1]} : vector<2x96xf32> to vector<2x32xf32>
    %186 = vector.broadcast %8 : vector<1x32xf32> to vector<2x32xf32>
    %187 = arith.addf %185, %186 : vector<2x32xf32>
    %188 = arith.mulf %175, %187 : vector<2x32xf32>
    %189 = arith.addf %184, %188 : vector<2x32xf32>
    %190 = math.tanh %189 : vector<2x32xf32>
    %cst_34 = arith.constant 1.000000e+00 : f32
    %191 = vector.broadcast %cst_34 : f32 to vector<2x32xf32>
    %192 = arith.subf %191, %183 : vector<2x32xf32>
    %193 = arith.mulf %192, %190 : vector<2x32xf32>
    %194 = arith.mulf %183, %164 : vector<2x32xf32>
    %195 = arith.addf %193, %194 : vector<2x32xf32>
    %196 = vector.extract_strided_slice %6 {offsets = [6, 0, 0], sizes = [1, 2, 96], strides = [1, 1, 1]} : vector<8x2x96xf32> to vector<1x2x96xf32>
    %197 = vector.shape_cast %196 : vector<1x2x96xf32> to vector<2x96xf32>
    %cst_35 = arith.constant dense<0.000000e+00> : vector<2x96xf32>
    %198 = tpu.matmul %195, %7, %cst_35 {dimension_numbers = #tpu.dot_dimension_numbers<[1], [0], [0], [1], [0, 0, 1, 1], [], []>} : vector<2x32xf32>, vector<32x96xf32>, vector<2x96xf32> -> vector<2x96xf32>
    %199 = vector.extract_strided_slice %197 {offsets = [0, 0], sizes = [2, 32], strides = [1, 1]} : vector<2x96xf32> to vector<2x32xf32>
    %200 = vector.extract_strided_slice %198 {offsets = [0, 0], sizes = [2, 32], strides = [1, 1]} : vector<2x96xf32> to vector<2x32xf32>
    %201 = arith.addf %199, %200 : vector<2x32xf32>
    %202 = arith.negf %201 : vector<2x32xf32>
    %203 = math.exp %202 : vector<2x32xf32>
    %cst_36 = arith.constant 1.000000e+00 : f32
    %204 = vector.broadcast %cst_36 : f32 to vector<2x32xf32>
    %205 = arith.addf %204, %203 : vector<2x32xf32>
    %206 = arith.divf %204, %205 : vector<2x32xf32>
    %207 = vector.extract_strided_slice %197 {offsets = [0, 32], sizes = [2, 32], strides = [1, 1]} : vector<2x96xf32> to vector<2x32xf32>
    %208 = vector.extract_strided_slice %198 {offsets = [0, 32], sizes = [2, 32], strides = [1, 1]} : vector<2x96xf32> to vector<2x32xf32>
    %209 = arith.addf %207, %208 : vector<2x32xf32>
    %210 = arith.negf %209 : vector<2x32xf32>
    %211 = math.exp %210 : vector<2x32xf32>
    %cst_37 = arith.constant 1.000000e+00 : f32
    %212 = vector.broadcast %cst_37 : f32 to vector<2x32xf32>
    %213 = arith.addf %212, %211 : vector<2x32xf32>
    %214 = arith.divf %212, %213 : vector<2x32xf32>
    %215 = vector.extract_strided_slice %197 {offsets = [0, 64], sizes = [2, 32], strides = [1, 1]} : vector<2x96xf32> to vector<2x32xf32>
    %216 = vector.extract_strided_slice %198 {offsets = [0, 64], sizes = [2, 32], strides = [1, 1]} : vector<2x96xf32> to vector<2x32xf32>
    %217 = vector.broadcast %8 : vector<1x32xf32> to vector<2x32xf32>
    %218 = arith.addf %216, %217 : vector<2x32xf32>
    %219 = arith.mulf %206, %218 : vector<2x32xf32>
    %220 = arith.addf %215, %219 : vector<2x32xf32>
    %221 = math.tanh %220 : vector<2x32xf32>
    %cst_38 = arith.constant 1.000000e+00 : f32
    %222 = vector.broadcast %cst_38 : f32 to vector<2x32xf32>
    %223 = arith.subf %222, %214 : vector<2x32xf32>
    %224 = arith.mulf %223, %221 : vector<2x32xf32>
    %225 = arith.mulf %214, %195 : vector<2x32xf32>
    %226 = arith.addf %224, %225 : vector<2x32xf32>
    %227 = vector.extract_strided_slice %6 {offsets = [7, 0, 0], sizes = [1, 2, 96], strides = [1, 1, 1]} : vector<8x2x96xf32> to vector<1x2x96xf32>
    %228 = vector.shape_cast %227 : vector<1x2x96xf32> to vector<2x96xf32>
    %cst_39 = arith.constant dense<0.000000e+00> : vector<2x96xf32>
    %229 = tpu.matmul %226, %7, %cst_39 {dimension_numbers = #tpu.dot_dimension_numbers<[1], [0], [0], [1], [0, 0, 1, 1], [], []>} : vector<2x32xf32>, vector<32x96xf32>, vector<2x96xf32> -> vector<2x96xf32>
    %230 = vector.extract_strided_slice %228 {offsets = [0, 0], sizes = [2, 32], strides = [1, 1]} : vector<2x96xf32> to vector<2x32xf32>
    %231 = vector.extract_strided_slice %229 {offsets = [0, 0], sizes = [2, 32], strides = [1, 1]} : vector<2x96xf32> to vector<2x32xf32>
    %232 = arith.addf %230, %231 : vector<2x32xf32>
    %233 = arith.negf %232 : vector<2x32xf32>
    %234 = math.exp %233 : vector<2x32xf32>
    %cst_40 = arith.constant 1.000000e+00 : f32
    %235 = vector.broadcast %cst_40 : f32 to vector<2x32xf32>
    %236 = arith.addf %235, %234 : vector<2x32xf32>
    %237 = arith.divf %235, %236 : vector<2x32xf32>
    %238 = vector.extract_strided_slice %228 {offsets = [0, 32], sizes = [2, 32], strides = [1, 1]} : vector<2x96xf32> to vector<2x32xf32>
    %239 = vector.extract_strided_slice %229 {offsets = [0, 32], sizes = [2, 32], strides = [1, 1]} : vector<2x96xf32> to vector<2x32xf32>
    %240 = arith.addf %238, %239 : vector<2x32xf32>
    %241 = arith.negf %240 : vector<2x32xf32>
    %242 = math.exp %241 : vector<2x32xf32>
    %cst_41 = arith.constant 1.000000e+00 : f32
    %243 = vector.broadcast %cst_41 : f32 to vector<2x32xf32>
    %244 = arith.addf %243, %242 : vector<2x32xf32>
    %245 = arith.divf %243, %244 : vector<2x32xf32>
    %246 = vector.extract_strided_slice %228 {offsets = [0, 64], sizes = [2, 32], strides = [1, 1]} : vector<2x96xf32> to vector<2x32xf32>
    %247 = vector.extract_strided_slice %229 {offsets = [0, 64], sizes = [2, 32], strides = [1, 1]} : vector<2x96xf32> to vector<2x32xf32>
    %248 = vector.broadcast %8 : vector<1x32xf32> to vector<2x32xf32>
    %249 = arith.addf %247, %248 : vector<2x32xf32>
    %250 = arith.mulf %237, %249 : vector<2x32xf32>
    %251 = arith.addf %246, %250 : vector<2x32xf32>
    %252 = math.tanh %251 : vector<2x32xf32>
    %cst_42 = arith.constant 1.000000e+00 : f32
    %253 = vector.broadcast %cst_42 : f32 to vector<2x32xf32>
    %254 = arith.subf %253, %245 : vector<2x32xf32>
    %255 = arith.mulf %254, %252 : vector<2x32xf32>
    %256 = arith.mulf %245, %226 : vector<2x32xf32>
    %257 = arith.addf %255, %256 : vector<2x32xf32>
    %c0_43 = arith.constant 0 : index
    %c0_44 = arith.constant 0 : index
    %258 = vector.load %arg11[%c0_43, %c0_44] : memref<2x32xf32, #tpu.memory_space<vmem>>, vector<2x32xf32>
    tpu.vector_store %arg11[%c0_43, %c0_44], %257 {strides = array<i32>} : memref<2x32xf32, #tpu.memory_space<vmem>>, vector<2x32xf32>,
    %c0_45 = arith.constant 0 : index
    %c0_46 = arith.constant 0 : index
    %259 = vector.load %arg6[%c0_45, %c0_46] : memref<32x192xf32, #tpu.memory_space<vmem>>, vector<32x192xf32>
    %c0_47 = arith.constant 0 : index
    %c0_48 = arith.constant 0 : index
    %260 = vector.load %arg7[%c0_47, %c0_48] : memref<1x192xf32, #tpu.memory_space<vmem>>, vector<1x192xf32>
    %cst_49 = arith.constant dense<0.000000e+00> : vector<2x192xf32>
    %261 = tpu.matmul %257, %259, %cst_49 {dimension_numbers = #tpu.dot_dimension_numbers<[1], [0], [0], [1], [0, 0, 1, 1], [], []>} : vector<2x32xf32>, vector<32x192xf32>, vector<2x192xf32> -> vector<2x192xf32>
    %262 = vector.broadcast %260 : vector<1x192xf32> to vector<2x192xf32>
    %263 = arith.addf %261, %262 : vector<2x192xf32>
    %264 = vector.extract_strided_slice %263 {offsets = [0, 0], sizes = [2, 96], strides = [1, 1]} : vector<2x192xf32> to vector<2x96xf32>
    %265 = vector.extract_strided_slice %263 {offsets = [0, 96], sizes = [2, 96], strides = [1, 1]} : vector<2x192xf32> to vector<2x96xf32>
    %266 = vector.extract_strided_slice %264 {offsets = [0, 0], sizes = [2, 32], strides = [1, 1]} : vector<2x96xf32> to vector<2x32xf32>
    %267 = vector.extract_strided_slice %265 {offsets = [0, 0], sizes = [2, 32], strides = [1, 1]} : vector<2x96xf32> to vector<2x32xf32>
    %268 = arith.addf %266, %267 : vector<2x32xf32>
    %269 = arith.negf %268 : vector<2x32xf32>
    %270 = math.exp %269 : vector<2x32xf32>
    %cst_50 = arith.constant 1.000000e+00 : f32
    %271 = vector.broadcast %cst_50 : f32 to vector<2x32xf32>
    %272 = arith.addf %271, %270 : vector<2x32xf32>
    %273 = arith.divf %271, %272 : vector<2x32xf32>
    %274 = vector.extract_strided_slice %264 {offsets = [0, 32], sizes = [2, 32], strides = [1, 1]} : vector<2x96xf32> to vector<2x32xf32>
    %275 = vector.extract_strided_slice %265 {offsets = [0, 32], sizes = [2, 32], strides = [1, 1]} : vector<2x96xf32> to vector<2x32xf32>
    %276 = arith.addf %274, %275 : vector<2x32xf32>
    %277 = arith.negf %276 : vector<2x32xf32>
    %278 = math.exp %277 : vector<2x32xf32>
    %cst_51 = arith.constant 1.000000e+00 : f32
    %279 = vector.broadcast %cst_51 : f32 to vector<2x32xf32>
    %280 = arith.addf %279, %278 : vector<2x32xf32>
    %281 = arith.divf %279, %280 : vector<2x32xf32>
    %282 = vector.extract_strided_slice %264 {offsets = [0, 64], sizes = [2, 32], strides = [1, 1]} : vector<2x96xf32> to vector<2x32xf32>
    %283 = vector.extract_strided_slice %265 {offsets = [0, 64], sizes = [2, 32], strides = [1, 1]} : vector<2x96xf32> to vector<2x32xf32>
    %284 = arith.mulf %273, %283 : vector<2x32xf32>
    %285 = arith.addf %282, %284 : vector<2x32xf32>
    %286 = math.tanh %285 : vector<2x32xf32>
    %cst_52 = arith.constant 1.000000e+00 : f32
    %287 = vector.broadcast %cst_52 : f32 to vector<2x32xf32>
    %288 = arith.subf %287, %281 : vector<2x32xf32>
    %289 = arith.mulf %288, %286 : vector<2x32xf32>
    %290 = arith.mulf %281, %257 : vector<2x32xf32>
    %291 = arith.addf %289, %290 : vector<2x32xf32>
    %cst_53 = arith.constant dense<0.000000e+00> : vector<2x192xf32>
    %292 = tpu.matmul %291, %259, %cst_53 {dimension_numbers = #tpu.dot_dimension_numbers<[1], [0], [0], [1], [0, 0, 1, 1], [], []>} : vector<2x32xf32>, vector<32x192xf32>, vector<2x192xf32> -> vector<2x192xf32>
    %293 = vector.broadcast %260 : vector<1x192xf32> to vector<2x192xf32>
    %294 = arith.addf %292, %293 : vector<2x192xf32>
    %295 = vector.extract_strided_slice %294 {offsets = [0, 0], sizes = [2, 96], strides = [1, 1]} : vector<2x192xf32> to vector<2x96xf32>
    %296 = vector.extract_strided_slice %294 {offsets = [0, 96], sizes = [2, 96], strides = [1, 1]} : vector<2x192xf32> to vector<2x96xf32>
    %297 = vector.extract_strided_slice %295 {offsets = [0, 0], sizes = [2, 32], strides = [1, 1]} : vector<2x96xf32> to vector<2x32xf32>
    %298 = vector.extract_strided_slice %296 {offsets = [0, 0], sizes = [2, 32], strides = [1, 1]} : vector<2x96xf32> to vector<2x32xf32>
    %299 = arith.addf %297, %298 : vector<2x32xf32>
    %300 = arith.negf %299 : vector<2x32xf32>
    %301 = math.exp %300 : vector<2x32xf32>
    %cst_54 = arith.constant 1.000000e+00 : f32
    %302 = vector.broadcast %cst_54 : f32 to vector<2x32xf32>
    %303 = arith.addf %302, %301 : vector<2x32xf32>
    %304 = arith.divf %302, %303 : vector<2x32xf32>
    %305 = vector.extract_strided_slice %295 {offsets = [0, 32], sizes = [2, 32], strides = [1, 1]} : vector<2x96xf32> to vector<2x32xf32>
    %306 = vector.extract_strided_slice %296 {offsets = [0, 32], sizes = [2, 32], strides = [1, 1]} : vector<2x96xf32> to vector<2x32xf32>
    %307 = arith.addf %305, %306 : vector<2x32xf32>
    %308 = arith.negf %307 : vector<2x32xf32>
    %309 = math.exp %308 : vector<2x32xf32>
    %cst_55 = arith.constant 1.000000e+00 : f32
    %310 = vector.broadcast %cst_55 : f32 to vector<2x32xf32>
    %311 = arith.addf %310, %309 : vector<2x32xf32>
    %312 = arith.divf %310, %311 : vector<2x32xf32>
    %313 = vector.extract_strided_slice %295 {offsets = [0, 64], sizes = [2, 32], strides = [1, 1]} : vector<2x96xf32> to vector<2x32xf32>
    %314 = vector.extract_strided_slice %296 {offsets = [0, 64], sizes = [2, 32], strides = [1, 1]} : vector<2x96xf32> to vector<2x32xf32>
    %315 = arith.mulf %304, %314 : vector<2x32xf32>
    %316 = arith.addf %313, %315 : vector<2x32xf32>
    %317 = math.tanh %316 : vector<2x32xf32>
    %cst_56 = arith.constant 1.000000e+00 : f32
    %318 = vector.broadcast %cst_56 : f32 to vector<2x32xf32>
    %319 = arith.subf %318, %312 : vector<2x32xf32>
    %320 = arith.mulf %319, %317 : vector<2x32xf32>
    %321 = arith.mulf %312, %291 : vector<2x32xf32>
    %322 = arith.addf %320, %321 : vector<2x32xf32>
    %cst_57 = arith.constant dense<0.000000e+00> : vector<2x192xf32>
    %323 = tpu.matmul %322, %259, %cst_57 {dimension_numbers = #tpu.dot_dimension_numbers<[1], [0], [0], [1], [0, 0, 1, 1], [], []>} : vector<2x32xf32>, vector<32x192xf32>, vector<2x192xf32> -> vector<2x192xf32>
    %324 = vector.broadcast %260 : vector<1x192xf32> to vector<2x192xf32>
    %325 = arith.addf %323, %324 : vector<2x192xf32>
    %326 = vector.extract_strided_slice %325 {offsets = [0, 0], sizes = [2, 96], strides = [1, 1]} : vector<2x192xf32> to vector<2x96xf32>
    %327 = vector.extract_strided_slice %325 {offsets = [0, 96], sizes = [2, 96], strides = [1, 1]} : vector<2x192xf32> to vector<2x96xf32>
    %328 = vector.extract_strided_slice %326 {offsets = [0, 0], sizes = [2, 32], strides = [1, 1]} : vector<2x96xf32> to vector<2x32xf32>
    %329 = vector.extract_strided_slice %327 {offsets = [0, 0], sizes = [2, 32], strides = [1, 1]} : vector<2x96xf32> to vector<2x32xf32>
    %330 = arith.addf %328, %329 : vector<2x32xf32>
    %331 = arith.negf %330 : vector<2x32xf32>
    %332 = math.exp %331 : vector<2x32xf32>
    %cst_58 = arith.constant 1.000000e+00 : f32
    %333 = vector.broadcast %cst_58 : f32 to vector<2x32xf32>
    %334 = arith.addf %333, %332 : vector<2x32xf32>
    %335 = arith.divf %333, %334 : vector<2x32xf32>
    %336 = vector.extract_strided_slice %326 {offsets = [0, 32], sizes = [2, 32], strides = [1, 1]} : vector<2x96xf32> to vector<2x32xf32>
    %337 = vector.extract_strided_slice %327 {offsets = [0, 32], sizes = [2, 32], strides = [1, 1]} : vector<2x96xf32> to vector<2x32xf32>
    %338 = arith.addf %336, %337 : vector<2x32xf32>
    %339 = arith.negf %338 : vector<2x32xf32>
    %340 = math.exp %339 : vector<2x32xf32>
    %cst_59 = arith.constant 1.000000e+00 : f32
    %341 = vector.broadcast %cst_59 : f32 to vector<2x32xf32>
    %342 = arith.addf %341, %340 : vector<2x32xf32>
    %343 = arith.divf %341, %342 : vector<2x32xf32>
    %344 = vector.extract_strided_slice %326 {offsets = [0, 64], sizes = [2, 32], strides = [1, 1]} : vector<2x96xf32> to vector<2x32xf32>
    %345 = vector.extract_strided_slice %327 {offsets = [0, 64], sizes = [2, 32], strides = [1, 1]} : vector<2x96xf32> to vector<2x32xf32>
    %346 = arith.mulf %335, %345 : vector<2x32xf32>
    %347 = arith.addf %344, %346 : vector<2x32xf32>
    %348 = math.tanh %347 : vector<2x32xf32>
    %cst_60 = arith.constant 1.000000e+00 : f32
    %349 = vector.broadcast %cst_60 : f32 to vector<2x32xf32>
    %350 = arith.subf %349, %343 : vector<2x32xf32>
    %351 = arith.mulf %350, %348 : vector<2x32xf32>
    %352 = arith.mulf %343, %322 : vector<2x32xf32>
    %353 = arith.addf %351, %352 : vector<2x32xf32>
    %cst_61 = arith.constant dense<0.000000e+00> : vector<2x192xf32>
    %354 = tpu.matmul %353, %259, %cst_61 {dimension_numbers = #tpu.dot_dimension_numbers<[1], [0], [0], [1], [0, 0, 1, 1], [], []>} : vector<2x32xf32>, vector<32x192xf32>, vector<2x192xf32> -> vector<2x192xf32>
    %355 = vector.broadcast %260 : vector<1x192xf32> to vector<2x192xf32>
    %356 = arith.addf %354, %355 : vector<2x192xf32>
    %357 = vector.extract_strided_slice %356 {offsets = [0, 0], sizes = [2, 96], strides = [1, 1]} : vector<2x192xf32> to vector<2x96xf32>
    %358 = vector.extract_strided_slice %356 {offsets = [0, 96], sizes = [2, 96], strides = [1, 1]} : vector<2x192xf32> to vector<2x96xf32>
    %359 = vector.extract_strided_slice %357 {offsets = [0, 0], sizes = [2, 32], strides = [1, 1]} : vector<2x96xf32> to vector<2x32xf32>
    %360 = vector.extract_strided_slice %358 {offsets = [0, 0], sizes = [2, 32], strides = [1, 1]} : vector<2x96xf32> to vector<2x32xf32>
    %361 = arith.addf %359, %360 : vector<2x32xf32>
    %362 = arith.negf %361 : vector<2x32xf32>
    %363 = math.exp %362 : vector<2x32xf32>
    %cst_62 = arith.constant 1.000000e+00 : f32
    %364 = vector.broadcast %cst_62 : f32 to vector<2x32xf32>
    %365 = arith.addf %364, %363 : vector<2x32xf32>
    %366 = arith.divf %364, %365 : vector<2x32xf32>
    %367 = vector.extract_strided_slice %357 {offsets = [0, 32], sizes = [2, 32], strides = [1, 1]} : vector<2x96xf32> to vector<2x32xf32>
    %368 = vector.extract_strided_slice %358 {offsets = [0, 32], sizes = [2, 32], strides = [1, 1]} : vector<2x96xf32> to vector<2x32xf32>
    %369 = arith.addf %367, %368 : vector<2x32xf32>
    %370 = arith.negf %369 : vector<2x32xf32>
    %371 = math.exp %370 : vector<2x32xf32>
    %cst_63 = arith.constant 1.000000e+00 : f32
    %372 = vector.broadcast %cst_63 : f32 to vector<2x32xf32>
    %373 = arith.addf %372, %371 : vector<2x32xf32>
    %374 = arith.divf %372, %373 : vector<2x32xf32>
    %375 = vector.extract_strided_slice %357 {offsets = [0, 64], sizes = [2, 32], strides = [1, 1]} : vector<2x96xf32> to vector<2x32xf32>
    %376 = vector.extract_strided_slice %358 {offsets = [0, 64], sizes = [2, 32], strides = [1, 1]} : vector<2x96xf32> to vector<2x32xf32>
    %377 = arith.mulf %366, %376 : vector<2x32xf32>
    %378 = arith.addf %375, %377 : vector<2x32xf32>
    %379 = math.tanh %378 : vector<2x32xf32>
    %cst_64 = arith.constant 1.000000e+00 : f32
    %380 = vector.broadcast %cst_64 : f32 to vector<2x32xf32>
    %381 = arith.subf %380, %374 : vector<2x32xf32>
    %382 = arith.mulf %381, %379 : vector<2x32xf32>
    %383 = arith.mulf %374, %353 : vector<2x32xf32>
    %384 = arith.addf %382, %383 : vector<2x32xf32>
    %cst_65 = arith.constant dense<0.000000e+00> : vector<2x192xf32>
    %385 = tpu.matmul %384, %259, %cst_65 {dimension_numbers = #tpu.dot_dimension_numbers<[1], [0], [0], [1], [0, 0, 1, 1], [], []>} : vector<2x32xf32>, vector<32x192xf32>, vector<2x192xf32> -> vector<2x192xf32>
    %386 = vector.broadcast %260 : vector<1x192xf32> to vector<2x192xf32>
    %387 = arith.addf %385, %386 : vector<2x192xf32>
    %388 = vector.extract_strided_slice %387 {offsets = [0, 0], sizes = [2, 96], strides = [1, 1]} : vector<2x192xf32> to vector<2x96xf32>
    %389 = vector.extract_strided_slice %387 {offsets = [0, 96], sizes = [2, 96], strides = [1, 1]} : vector<2x192xf32> to vector<2x96xf32>
    %390 = vector.extract_strided_slice %388 {offsets = [0, 0], sizes = [2, 32], strides = [1, 1]} : vector<2x96xf32> to vector<2x32xf32>
    %391 = vector.extract_strided_slice %389 {offsets = [0, 0], sizes = [2, 32], strides = [1, 1]} : vector<2x96xf32> to vector<2x32xf32>
    %392 = arith.addf %390, %391 : vector<2x32xf32>
    %393 = arith.negf %392 : vector<2x32xf32>
    %394 = math.exp %393 : vector<2x32xf32>
    %cst_66 = arith.constant 1.000000e+00 : f32
    %395 = vector.broadcast %cst_66 : f32 to vector<2x32xf32>
    %396 = arith.addf %395, %394 : vector<2x32xf32>
    %397 = arith.divf %395, %396 : vector<2x32xf32>
    %398 = vector.extract_strided_slice %388 {offsets = [0, 32], sizes = [2, 32], strides = [1, 1]} : vector<2x96xf32> to vector<2x32xf32>
    %399 = vector.extract_strided_slice %389 {offsets = [0, 32], sizes = [2, 32], strides = [1, 1]} : vector<2x96xf32> to vector<2x32xf32>
    %400 = arith.addf %398, %399 : vector<2x32xf32>
    %401 = arith.negf %400 : vector<2x32xf32>
    %402 = math.exp %401 : vector<2x32xf32>
    %cst_67 = arith.constant 1.000000e+00 : f32
    %403 = vector.broadcast %cst_67 : f32 to vector<2x32xf32>
    %404 = arith.addf %403, %402 : vector<2x32xf32>
    %405 = arith.divf %403, %404 : vector<2x32xf32>
    %406 = vector.extract_strided_slice %388 {offsets = [0, 64], sizes = [2, 32], strides = [1, 1]} : vector<2x96xf32> to vector<2x32xf32>
    %407 = vector.extract_strided_slice %389 {offsets = [0, 64], sizes = [2, 32], strides = [1, 1]} : vector<2x96xf32> to vector<2x32xf32>
    %408 = arith.mulf %397, %407 : vector<2x32xf32>
    %409 = arith.addf %406, %408 : vector<2x32xf32>
    %410 = math.tanh %409 : vector<2x32xf32>
    %cst_68 = arith.constant 1.000000e+00 : f32
    %411 = vector.broadcast %cst_68 : f32 to vector<2x32xf32>
    %412 = arith.subf %411, %405 : vector<2x32xf32>
    %413 = arith.mulf %412, %410 : vector<2x32xf32>
    %414 = arith.mulf %405, %384 : vector<2x32xf32>
    %415 = arith.addf %413, %414 : vector<2x32xf32>
    %cst_69 = arith.constant dense<0.000000e+00> : vector<2x192xf32>
    %416 = tpu.matmul %415, %259, %cst_69 {dimension_numbers = #tpu.dot_dimension_numbers<[1], [0], [0], [1], [0, 0, 1, 1], [], []>} : vector<2x32xf32>, vector<32x192xf32>, vector<2x192xf32> -> vector<2x192xf32>
    %417 = vector.broadcast %260 : vector<1x192xf32> to vector<2x192xf32>
    %418 = arith.addf %416, %417 : vector<2x192xf32>
    %419 = vector.extract_strided_slice %418 {offsets = [0, 0], sizes = [2, 96], strides = [1, 1]} : vector<2x192xf32> to vector<2x96xf32>
    %420 = vector.extract_strided_slice %418 {offsets = [0, 96], sizes = [2, 96], strides = [1, 1]} : vector<2x192xf32> to vector<2x96xf32>
    %421 = vector.extract_strided_slice %419 {offsets = [0, 0], sizes = [2, 32], strides = [1, 1]} : vector<2x96xf32> to vector<2x32xf32>
    %422 = vector.extract_strided_slice %420 {offsets = [0, 0], sizes = [2, 32], strides = [1, 1]} : vector<2x96xf32> to vector<2x32xf32>
    %423 = arith.addf %421, %422 : vector<2x32xf32>
    %424 = arith.negf %423 : vector<2x32xf32>
    %425 = math.exp %424 : vector<2x32xf32>
    %cst_70 = arith.constant 1.000000e+00 : f32
    %426 = vector.broadcast %cst_70 : f32 to vector<2x32xf32>
    %427 = arith.addf %426, %425 : vector<2x32xf32>
    %428 = arith.divf %426, %427 : vector<2x32xf32>
    %429 = vector.extract_strided_slice %419 {offsets = [0, 32], sizes = [2, 32], strides = [1, 1]} : vector<2x96xf32> to vector<2x32xf32>
    %430 = vector.extract_strided_slice %420 {offsets = [0, 32], sizes = [2, 32], strides = [1, 1]} : vector<2x96xf32> to vector<2x32xf32>
    %431 = arith.addf %429, %430 : vector<2x32xf32>
    %432 = arith.negf %431 : vector<2x32xf32>
    %433 = math.exp %432 : vector<2x32xf32>
    %cst_71 = arith.constant 1.000000e+00 : f32
    %434 = vector.broadcast %cst_71 : f32 to vector<2x32xf32>
    %435 = arith.addf %434, %433 : vector<2x32xf32>
    %436 = arith.divf %434, %435 : vector<2x32xf32>
    %437 = vector.extract_strided_slice %419 {offsets = [0, 64], sizes = [2, 32], strides = [1, 1]} : vector<2x96xf32> to vector<2x32xf32>
    %438 = vector.extract_strided_slice %420 {offsets = [0, 64], sizes = [2, 32], strides = [1, 1]} : vector<2x96xf32> to vector<2x32xf32>
    %439 = arith.mulf %428, %438 : vector<2x32xf32>
    %440 = arith.addf %437, %439 : vector<2x32xf32>
    %441 = math.tanh %440 : vector<2x32xf32>
    %cst_72 = arith.constant 1.000000e+00 : f32
    %442 = vector.broadcast %cst_72 : f32 to vector<2x32xf32>
    %443 = arith.subf %442, %436 : vector<2x32xf32>
    %444 = arith.mulf %443, %441 : vector<2x32xf32>
    %445 = arith.mulf %436, %415 : vector<2x32xf32>
    %446 = arith.addf %444, %445 : vector<2x32xf32>
    %cst_73 = arith.constant dense<0.000000e+00> : vector<2x192xf32>
    %447 = tpu.matmul %446, %259, %cst_73 {dimension_numbers = #tpu.dot_dimension_numbers<[1], [0], [0], [1], [0, 0, 1, 1], [], []>} : vector<2x32xf32>, vector<32x192xf32>, vector<2x192xf32> -> vector<2x192xf32>
    %448 = vector.broadcast %260 : vector<1x192xf32> to vector<2x192xf32>
    %449 = arith.addf %447, %448 : vector<2x192xf32>
    %450 = vector.extract_strided_slice %449 {offsets = [0, 0], sizes = [2, 96], strides = [1, 1]} : vector<2x192xf32> to vector<2x96xf32>
    %451 = vector.extract_strided_slice %449 {offsets = [0, 96], sizes = [2, 96], strides = [1, 1]} : vector<2x192xf32> to vector<2x96xf32>
    %452 = vector.extract_strided_slice %450 {offsets = [0, 0], sizes = [2, 32], strides = [1, 1]} : vector<2x96xf32> to vector<2x32xf32>
    %453 = vector.extract_strided_slice %451 {offsets = [0, 0], sizes = [2, 32], strides = [1, 1]} : vector<2x96xf32> to vector<2x32xf32>
    %454 = arith.addf %452, %453 : vector<2x32xf32>
    %455 = arith.negf %454 : vector<2x32xf32>
    %456 = math.exp %455 : vector<2x32xf32>
    %cst_74 = arith.constant 1.000000e+00 : f32
    %457 = vector.broadcast %cst_74 : f32 to vector<2x32xf32>
    %458 = arith.addf %457, %456 : vector<2x32xf32>
    %459 = arith.divf %457, %458 : vector<2x32xf32>
    %460 = vector.extract_strided_slice %450 {offsets = [0, 32], sizes = [2, 32], strides = [1, 1]} : vector<2x96xf32> to vector<2x32xf32>
    %461 = vector.extract_strided_slice %451 {offsets = [0, 32], sizes = [2, 32], strides = [1, 1]} : vector<2x96xf32> to vector<2x32xf32>
    %462 = arith.addf %460, %461 : vector<2x32xf32>
    %463 = arith.negf %462 : vector<2x32xf32>
    %464 = math.exp %463 : vector<2x32xf32>
    %cst_75 = arith.constant 1.000000e+00 : f32
    %465 = vector.broadcast %cst_75 : f32 to vector<2x32xf32>
    %466 = arith.addf %465, %464 : vector<2x32xf32>
    %467 = arith.divf %465, %466 : vector<2x32xf32>
    %468 = vector.extract_strided_slice %450 {offsets = [0, 64], sizes = [2, 32], strides = [1, 1]} : vector<2x96xf32> to vector<2x32xf32>
    %469 = vector.extract_strided_slice %451 {offsets = [0, 64], sizes = [2, 32], strides = [1, 1]} : vector<2x96xf32> to vector<2x32xf32>
    %470 = arith.mulf %459, %469 : vector<2x32xf32>
    %471 = arith.addf %468, %470 : vector<2x32xf32>
    %472 = math.tanh %471 : vector<2x32xf32>
    %cst_76 = arith.constant 1.000000e+00 : f32
    %473 = vector.broadcast %cst_76 : f32 to vector<2x32xf32>
    %474 = arith.subf %473, %467 : vector<2x32xf32>
    %475 = arith.mulf %474, %472 : vector<2x32xf32>
    %476 = arith.mulf %467, %446 : vector<2x32xf32>
    %477 = arith.addf %475, %476 : vector<2x32xf32>
    %cst_77 = arith.constant dense<0.000000e+00> : vector<2x192xf32>
    %478 = tpu.matmul %477, %259, %cst_77 {dimension_numbers = #tpu.dot_dimension_numbers<[1], [0], [0], [1], [0, 0, 1, 1], [], []>} : vector<2x32xf32>, vector<32x192xf32>, vector<2x192xf32> -> vector<2x192xf32>
    %479 = vector.broadcast %260 : vector<1x192xf32> to vector<2x192xf32>
    %480 = arith.addf %478, %479 : vector<2x192xf32>
    %481 = vector.extract_strided_slice %480 {offsets = [0, 0], sizes = [2, 96], strides = [1, 1]} : vector<2x192xf32> to vector<2x96xf32>
    %482 = vector.extract_strided_slice %480 {offsets = [0, 96], sizes = [2, 96], strides = [1, 1]} : vector<2x192xf32> to vector<2x96xf32>
    %483 = vector.extract_strided_slice %481 {offsets = [0, 0], sizes = [2, 32], strides = [1, 1]} : vector<2x96xf32> to vector<2x32xf32>
    %484 = vector.extract_strided_slice %482 {offsets = [0, 0], sizes = [2, 32], strides = [1, 1]} : vector<2x96xf32> to vector<2x32xf32>
    %485 = arith.addf %483, %484 : vector<2x32xf32>
    %486 = arith.negf %485 : vector<2x32xf32>
    %487 = math.exp %486 : vector<2x32xf32>
    %cst_78 = arith.constant 1.000000e+00 : f32
    %488 = vector.broadcast %cst_78 : f32 to vector<2x32xf32>
    %489 = arith.addf %488, %487 : vector<2x32xf32>
    %490 = arith.divf %488, %489 : vector<2x32xf32>
    %491 = vector.extract_strided_slice %481 {offsets = [0, 32], sizes = [2, 32], strides = [1, 1]} : vector<2x96xf32> to vector<2x32xf32>
    %492 = vector.extract_strided_slice %482 {offsets = [0, 32], sizes = [2, 32], strides = [1, 1]} : vector<2x96xf32> to vector<2x32xf32>
    %493 = arith.addf %491, %492 : vector<2x32xf32>
    %494 = arith.negf %493 : vector<2x32xf32>
    %495 = math.exp %494 : vector<2x32xf32>
    %cst_79 = arith.constant 1.000000e+00 : f32
    %496 = vector.broadcast %cst_79 : f32 to vector<2x32xf32>
    %497 = arith.addf %496, %495 : vector<2x32xf32>
    %498 = arith.divf %496, %497 : vector<2x32xf32>
    %499 = vector.extract_strided_slice %481 {offsets = [0, 64], sizes = [2, 32], strides = [1, 1]} : vector<2x96xf32> to vector<2x32xf32>
    %500 = vector.extract_strided_slice %482 {offsets = [0, 64], sizes = [2, 32], strides = [1, 1]} : vector<2x96xf32> to vector<2x32xf32>
    %501 = arith.mulf %490, %500 : vector<2x32xf32>
    %502 = arith.addf %499, %501 : vector<2x32xf32>
    %503 = math.tanh %502 : vector<2x32xf32>
    %cst_80 = arith.constant 1.000000e+00 : f32
    %504 = vector.broadcast %cst_80 : f32 to vector<2x32xf32>
    %505 = arith.subf %504, %498 : vector<2x32xf32>
    %506 = arith.mulf %505, %503 : vector<2x32xf32>
    %507 = arith.mulf %498, %477 : vector<2x32xf32>
    %508 = arith.addf %506, %507 : vector<2x32xf32>
    %509 = tpu.concatenate %508, %477, %446, %415, %384, %353, %322, %291 in 0 : vector<2x32xf32>, vector<2x32xf32>, vector<2x32xf32>, vector<2x32xf32>, vector<2x32xf32>, vector<2x32xf32>, vector<2x32xf32>, vector<2x32xf32> -> vector<16x32xf32>
    %c0_81 = arith.constant 0 : index
    %c0_82 = arith.constant 0 : index
    %510 = vector.load %arg8[%c0_81, %c0_82] : memref<32x16xf32, #tpu.memory_space<vmem>>, vector<32x16xf32>
    %cst_83 = arith.constant dense<0.000000e+00> : vector<16x16xf32>
    %511 = tpu.matmul %509, %510, %cst_83 {dimension_numbers = #tpu.dot_dimension_numbers<[1], [0], [0], [1], [0, 0, 1, 1], [], []>} : vector<16x32xf32>, vector<32x16xf32>, vector<16x16xf32> -> vector<16x16xf32>
    %c0_84 = arith.constant 0 : index
    %c0_85 = arith.constant 0 : index
    %512 = vector.load %arg9[%c0_84, %c0_85] : memref<1x16xf32, #tpu.memory_space<vmem>>, vector<1x16xf32>
    %513 = vector.broadcast %512 : vector<1x16xf32> to vector<16x16xf32>
    %514 = arith.addf %511, %513 : vector<16x16xf32>
    %c0_86 = arith.constant 0 : index
    %c0_87 = arith.constant 0 : index
    %515 = vector.load %arg10[%c0_86, %c0_87] : memref<16x16xf32, #tpu.memory_space<vmem>>, vector<16x16xf32>
    tpu.vector_store %arg10[%c0_86, %c0_87], %514 {strides = array<i32>} : memref<16x16xf32, #tpu.memory_space<vmem>>, vector<16x16xf32>,
    return
  }
}

</mosaic_0001>

<bundles_post_ra>
// kernel: recurrent_ae_forward.1
= control target key start
LH: loop header
LB: loop body
LE: loop exit
PB: predicated region body
PF: predicated region fallthrough
CT: control target
= control target key end

     0   :  { %17 = vsyncpa [#allocation3], 0  ;;  %s3298_s0 = inlined_call_operand.vmem [shape: f32[16,12], index: 0, kind: input, shape index: {}]   ;;  %s3299_s1 = inlined_call_operand.hbm [shape: f32[2,32], index: 1, kind: input, shape index: {}]   ;;  %s3300_s2 = inlined_call_operand.hbm [shape: f32[12,96], index: 2, kind: input, shape index: {}]   ;;  %s3301_s3 = inlined_call_operand.vmem [shape: f32[32,96], index: 3, kind: input, shape index: {}]   ;;  %s3302_s4 = inlined_call_operand.vmem [shape: f32[1,96], index: 4, kind: input, shape index: {}]   ;;  %s3303_s5 = inlined_call_operand.hbm [shape: f32[1,32], index: 5, kind: input, shape index: {}]   ;;  %s3304_s6 = inlined_call_operand.vmem [shape: f32[32,192], index: 6, kind: input, shape index: {}]   ;;  %s3305_s7 = inlined_call_operand.hbm [shape: f32[1,192], index: 7, kind: input, shape index: {}]   ;;  %s3306_s8 = inlined_call_operand.vmem [shape: f32[32,16], index: 8, kind: input, shape index: {}]   ;;  %s3307_s9 = inlined_call_operand.hbm [shape: f32[1,16], index: 9, kind: input, shape index: {}]   ;;  %s3308_s10 = inlined_call_operand.vmem [shape: f32[16,16], index: 10, kind: output, shape index: {0}]   ;;  %s3309_s11 = inlined_call_operand.hbm [shape: f32[2,32], index: 11, kind: output, shape index: {1}]  }
   0x1   :  { %18 = vsyncpa [#allocation6], 0 }
   0x2   :  { %19 = vsyncpa [#allocation9], 0 }
   0x3   :  { %20 = vsyncpa [#allocation4], 0  ;;  %s2755_s17 = smov [#allocation5]  }
   0x4   :  { %s38_s18 = sshll.u32 %s2755_s17, 4  ;;  %s39_s18 = int_to_ptr.vmem [resolvable:$true] %s38_s18 }
   0x5   :  { %s2635_s19 = scalar_lea.vmem %s39_s18, 256  ;;  %p2640_p1 = scmp.lt.s32.totalorder %s39_s18, %s39_s18 }
   0x6   :  { %p2636_p0 = scmp.ne.s32.totalorder %s39_s18, %s2635_s19  ;;  %p2641_p2 = scmp.lt.s32.totalorder %s2635_s19, %s2635_s19 }
   0x8   :  { %p2642_p3 = por %p2641_p2, %p2640_p1 }
   0xa   :  { %p2643_p4 = pnand %p2642_p3, %p2636_p0 }
   0xc   :  { %2646 = shalt.err (!%p2643_p4)
}
   0xd   :  { %s2756_s20 = smov 128   ;;  %s2757_s21 = smov 8  }
   0xe   :  { %44 = dma.hbm_to_vmem [thread:$0]  %s3300_s2, 256, %s39_s18, [#allocation6], %s2756_s20, %s2756_s20, %s2757_s21  }
   0xf   :  { %s2758_s24 = smov [#allocation8]   ;;  %s2759_s26 = smov [#allocation2]  }
  0x10   :  { %s67_s25 = sshll.u32 %s2758_s24, 4  ;;  %s29_s27 = sshll.u32 %s2759_s26, 4  ;;  %s68_s25 = int_to_ptr.vmem [resolvable:$true] %s67_s25  ;;  %s30_s27 = int_to_ptr.vmem [resolvable:$true] %s29_s27 }
  0x11   :  { %s2655_s28 = scalar_lea.vmem %s68_s25, 32  ;;  %p2660_p6 = scmp.lt.s32.totalorder %s68_s25, %s68_s25 }
  0x12   :  { %p2656_p5 = scmp.ne.s32.totalorder %s68_s25, %s2655_s28  ;;  %p2661_p7 = scmp.lt.s32.totalorder %s2655_s28, %s2655_s28 }
  0x14   :  { %p2662_p8 = por %p2661_p7, %p2660_p6 }
  0x16   :  { %p2663_p9 = pnand %p2662_p8, %p2656_p5 }
  0x18   :  { %2666 = shalt.err (!%p2663_p9)
}
  0x19   :  { %70 = dma.hbm_to_vmem [thread:$0]  %s3305_s7, 32, %s68_s25, [#allocation9]  }
  0x1a   :  { %s2675_s12 = scalar_lea.vmem %s30_s27, 32  ;;  %p2680_p11 = scmp.lt.s32.totalorder %s30_s27, %s30_s27 }
  0x1b   :  { %p2676_p10 = scmp.ne.s32.totalorder %s30_s27, %s2675_s12  ;;  %p2681_p12 = scmp.lt.s32.totalorder %s2675_s12, %s2675_s12 }
  0x1d   :  { %p2682_p13 = por %p2681_p12, %p2680_p11 }
  0x1f   :  { %p2683_p0 = pnand %p2682_p13, %p2676_p10 }
  0x21   :  { %2686 = shalt.err (!%p2683_p0)
}
  0x22   :  { %32 = dma.hbm_to_vmem [thread:$0]  %s3299_s1, 32, %s30_s27, [#allocation3]  }
  0x23   :  { %s2760_s14 = smov [#allocation7]   ;;  %s2761_s16 = smov [#allocation10]  }
  0x24   :  { %s55_s15 = sshll.u32 %s2760_s14, 4  ;;  %s79_s17 = sshll.u32 %s2761_s16, 4  ;;  %s56_s15 = int_to_ptr.vmem [resolvable:$true] %s55_s15  ;;  %s80_s17 = int_to_ptr.vmem [resolvable:$true] %s79_s17 }
  0x25   :  { %s2695_s18 = scalar_lea.vmem %s56_s15, 16  ;;  %s2699_s7 = scalar_lea.vmem %s56_s15, 32 }
  0x26   :  { %p2696_p1 = scmp.ne.s32.totalorder %s56_s15, %s2695_s18  ;;  %p2700_p2 = scmp.lt.s32.totalorder %s56_s15, %s56_s15 }
  0x27   :  { %p2701_p3 = scmp.lt.s32.totalorder %s2699_s7, %s2695_s18 }
  0x29   :  { %p2702_p4 = por %p2701_p3, %p2700_p2 }
  0x2b   :  { %p2703_p5 = pnand %p2702_p4, %p2696_p1 }
  0x2d   :  { %2706 = shalt.err (!%p2703_p5)
}
  0x2e   :  { %58 = dma.hbm_to_vmem [thread:$0]  %s3303_s5, 16, %s56_s15, [#allocation6]  }
  0x2f   :  { %s2715_s21 = scalar_lea.vmem %s80_s17, 16  ;;  %s2719_s1 = scalar_lea.vmem %s80_s17, 32 }
  0x30   :  { %p2716_p6 = scmp.ne.s32.totalorder %s80_s17, %s2715_s21  ;;  %p2720_p7 = scmp.lt.s32.totalorder %s80_s17, %s80_s17 }
  0x31   :  { %p2721_p8 = scmp.lt.s32.totalorder %s2719_s1, %s2715_s21 }
  0x33   :  { %p2722_p9 = por %p2721_p8, %p2720_p7 }
  0x35   :  { %p2723_p10 = pnand %p2722_p9, %p2716_p6 }
  0x37   :  { %2726 = shalt.err (!%p2723_p10)
}
  0x38   :  { %82 = dma.hbm_to_vmem [thread:$0]  %s3307_s9, 16, %s80_s17, [#allocation9]  }
  0x39   :  { %2747 = dma.done.wait [#allocation3], 32  }
  0x3a   :  { %2748 = vsyncadd [#allocation3], 4294967264 }
  0x3b   :  { %2749 = dma.done.wait [#allocation6], 272  }
  0x3c   :  { %2750 = vsyncadd [#allocation6], 4294967024 }
  0x3d   :  { %2751 = dma.done.wait [#allocation9], 48  }
  0x3e   :  { %2752 = vsyncadd [#allocation9], 4294967248  ;;  %v2762_v0 = vmov 0.0   ;;  %vm2763_vm0 = vmmov 0   ;;  %vm116_vm1 = vcmask 1043456   ;;  %v2850_v2 = vld [vmem:[%s3301_s3 + $0x18] sm:$0xff]  ;;  %v201_v13 = vlaneseq }
  0x3f   :  { %2386 = vmatprep.subr.mxu1 %v2762_v0  ;;  %2394 = vmatprep.mubr.msk.f32.mxu1 %vm2763_vm0, %v2762_v0  ;;  %v101_v1 = vld [vmem:[#allocation5 + $0x8] sm:$0xf]  ;;  %v100_v3 = vld [vmem:[#allocation5] sm:$0xff]  ;;  %v2857_v4 = vld [vmem:[%s3301_s3 + $0x10] sm:$0xff]  ;;  %vm109_vm2 = vcmask 97280   ;;  %vm245_vm3 = vcmask 261120  }
  0x40   :  { %2379 = vmatprep.subr.msk.mxu0 %vm116_vm1, %v101_v1  ;;  %2387 = vmatpush3.msra.mxu1 %v2850_v2  ;;  %v98_v5 = vld [vmem:[%s3298_s0] sm:$0xff]  ;;  %v99_v6 = vld [vmem:[%s3298_s0 + $0x8] sm:$0xff]  ;;  %v2287_v8 = vld [vmem:[#allocation7] ss:$0 sm:$0xff]  ;;  %s2764_s0 = smov 64   ;;  %v2906_v15 = vshrl.u32 %v201_v13, 7 }
  0x41   :  { %2380 = vmatpush3.msk.msra.mxu0 %vm116_vm1, %v101_v1  ;;  %2388 = vmatprep.subr.mxu1 %v2762_v0  ;;  %v2871_v7 = vld [vmem:[%s3301_s3 + $0x8] sm:$0xff]  ;;  %v2877_v9 = vld [vmem:[%s3301_s3] sm:$0xff]  ;;  %v2765_v11 = vmov 1983009808   ;;  %s2766_s15 = smov 32   ;;  %vm1194_vm4 = vcmask 254976  }
  0x42   :  { %2381 = vmatprep.subr.mxu0 %v100_v3  ;;  %2389 = vmatpush3.msra.mxu1 %v2857_v4  ;;  %v244_v10 = vld [vmem:[#allocation2] sm:$0x3]  ;;  %v199_v12 = vunpack.c.l.s4 %v2765_v11  ;;  %vm2153_vm5 = vcmask 1041408   ;;  %vm2156_vm6 = vcmask 1045504  }
  0x43   :  { %2382 = vmatpush3.msra.mxu0 %v100_v3  ;;  %2383 = vmatprep.mubr.msk.f32.mxu0 %vm109_vm2, %v98_v5  ;;  %v2281_v17 = vld [vmem:[%s3302_s4] ss:$0 sm:$0xff]  ;;  %s2767_s4 = smov 96  }
  0x44   :  { %2390 = vmatprep.subr.mxu1 %v2762_v0  ;;  %2384 = vmatmul.mubr.msk.f32.vlgmr.msra.gmra.mxu0 %vm109_vm2, %v99_v6  ;;  %v200_v14 = vunpack.c.0.s8 %v199_v12 }
  0x45   :  { %2391 = vmatpush3.msra.mxu1 %v2871_v7  ;;  %331 = vrot.lane.b32.xlu0 %v2287_v8, %s2764_s0 }
  0x46   :  { %2392 = vmatprep.subr.mxu1 %v2762_v0  ;;  %2397 = vmatprep.subr.mxu0 %v2762_v0  ;;  %v2916_v20 = vsub.s32 %v200_v14, %v2906_v15 }
  0x47   :  { %2393 = vmatpush3.msra.mxu1 %v2877_v9  ;;  %2398 = vmatpush3.msra.mxu0 %v2850_v2 }
  0x48   :  { %2395 = vmatmul.mubr.msk.f32.vlgmr.msra.gmra.mxu1 %vm245_vm3, %v244_v10  ;;  %2399 = vmatprep.subr.mxu0 %v2762_v0  ;;  %v365_v25 = vrot.slane %v244_v10, %v2916_v20 }
  0x49   :  { %2400 = vmatpush3.msra.mxu0 %v2857_v4  ;;  %2405 = vmatprep.mubr.msk.f32.mxu0 %vm2763_vm0, %v2762_v0 }
  0x4a   :  { %2401 = vmatprep.subr.mxu0 %v2762_v0  ;;  %2408 = vmatprep.subr.mxu1 %v2762_v0 }
  0x4b   :  { %2402 = vmatpush3.msra.mxu0 %v2871_v7  ;;  %2409 = vmatpush3.msra.mxu1 %v2850_v2 }
  0x4c   :  { %2403 = vmatprep.subr.mxu0 %v2762_v0  ;;  %2410 = vmatprep.subr.mxu1 %v2762_v0 }
  0x4d   :  { %2404 = vmatpush3.msra.mxu0 %v2877_v9  ;;  %2411 = vmatpush3.msra.mxu1 %v2857_v4 }
  0x4e   :  { %2412 = vmatprep.subr.mxu1 %v2762_v0  ;;  %2416 = vmatprep.mubr.msk.f32.mxu1 %vm2763_vm0, %v2762_v0 }
  0x4f   :  { %2413 = vmatpush3.msra.mxu1 %v2871_v7  ;;  %2419 = vmatprep.subr.mxu0 %v2762_v0 }
  0x50   :  { %2414 = vmatprep.subr.mxu1 %v2762_v0 }
  0x51   :  { %2415 = vmatpush3.msra.mxu1 %v2877_v9 }
  0x52   :  { %2430 = vmatprep.subr.mxu1 %v2762_v0 }
  0xb7   :  { %v2913_v19 = vpop.permute.xlu0 %331 }
 0x104   :  { %v2385_v16 = vpop.f32.mrf.mxu0 }
 0x105   :  { %v2911_v18 = vadd.f32 %v2385_v16, %v2281_v17 }
 0x106   :  { %v186_v26 = vpop.f32.mrf.mxu0 }
 0x107   :  { %v2923_v27 = vadd.f32 %v2281_v17, %v186_v26 }
 0x108   :  { %v315_v21 = vpop.f32.mrf.mxu1 }
 0x109   :  { %v334_v22 = vadd.f32 %v2913_v19, %v315_v21  ;;  %v204_v28 = vrot.slane %v2923_v27, %v2916_v20  ;;  %v197_v14 = vcombine.high %v2923_v27, %v2923_v27 }
 0x10a   :  { %v2396_v23 = vpop.f32.mrf.mxu1 }
 0x10b   :  { %v342_v24 = vrot.slane %v334_v22, %v2916_v20  ;;  %v319_v29 = vadd.f32 %v315_v21, %v204_v28  ;;  %v212_v51 = vcombine.high %v204_v28, %v204_v28  ;;  %v211_v16 = vrot.slane %v197_v14, %v2916_v20 }
 0x10d   :  { %343 = vrot.lane.b32.xlu0 %v342_v24, %s2764_s0  ;;  %v2286_v30 = vmul.f32 -1.442695, %v319_v29 }
 0x10f   :  { %2499 = vpow2.f32 %v2286_v30 }
 0x111   :  { %366 = vrot.lane.b32.xlu0 %v365_v25, %s2766_s15 }
 0x11c   :  { %v2500_v31 = vpop.eup %2499 }
 0x11d   :  { %v323_v32 = vadd.f32 1.0, %v2500_v31 }
 0x11f   :  { %2501 = vrcp.f32 %v323_v32 }
 0x12c   :  { %v2502_v33 = vpop.eup %2501 }
 0x12d   :  { %v353_v40 = vsub.f32 1.0, %v2502_v33 }
 0x17f   :  { %v344_v34 = vpop.permute.xlu0 %343 }
 0x180   :  { %v346_v35 = vmul.f32 %v2502_v33, %v344_v34 }
 0x182   :  { %348 = vrot.lane.b32.xlu1 %v346_v35, %s2764_s0 }
 0x183   :  { %v367_v39 = vpop.permute.xlu0 %366 }
 0x184   :  { %v369_v42 = vmul.f32 %v2502_v33, %v367_v39 }
 0x1f4   :  { %v349_v36 = vpop.permute.xlu1 %348 }
 0x1f5   :  { %v351_v37 = vadd.f32 %v349_v36, %v204_v28 }
 0x1f7   :  { %2503 = vtanh.f32 %v351_v37 }
 0x204   :  { %v2504_v38 = vpop.eup %2503 }
 0x205   :  { %355 = vrot.lane.b32.xlu1 %v2504_v38, %s2767_s4 }
 0x277   :  { %v356_v41 = vpop.permute.xlu1 %355 }
 0x278   :  { %v358_v43 = vmul.f32 %v356_v41, %v353_v40  ;;  %v213_v41 = vcombine.high %v211_v16, %v211_v16 }
 0x27a   :  { %v370_v44 = vadd.f32 %v369_v42, %v358_v43 }
 0x27c   :  { %v378_v45 = vrot.slane %v370_v44, %v2916_v20 }
 0x27e   :  { %379 = vrot.lane.b32.xlu1 %v378_v45, %s2767_s4 }
 0x2f0   :  { %v380_v46 = vpop.permute.xlu1 %379 }
 0x2f1   :  { %2406 = vmatmul.mubr.msk.f32.vlgmr.msra.gmra.mxu0 %vm245_vm3, %v380_v46 }
 0x2f2   :  { %2420 = vmatpush3.msra.mxu0 %v2850_v2  ;;  %2427 = vmatprep.mubr.msk.f32.mxu0 %vm2763_vm0, %v2762_v0 }
 0x2f3   :  { %2421 = vmatprep.subr.mxu0 %v2762_v0 }
 0x2f4   :  { %2422 = vmatpush3.msra.mxu0 %v2857_v4 }
 0x2f5   :  { %2423 = vmatprep.subr.mxu0 %v2762_v0 }
 0x2f6   :  { %2424 = vmatpush3.msra.mxu0 %v2871_v7 }
 0x2f7   :  { %2425 = vmatprep.subr.mxu0 %v2762_v0 }
 0x2f8   :  { %2426 = vmatpush3.msra.mxu0 %v2877_v9 }
 0x2f9   :  { %2441 = vmatprep.subr.mxu0 %v2762_v0 }
 0x3b1   :  { %v449_v47 = vpop.f32.mrf.mxu0 }
 0x3b2   :  { %v460_v48 = vadd.f32 %v449_v47, %v2913_v19  ;;  %v453_v52 = vadd.f32 %v449_v47, %v212_v51 }
 0x3b3   :  { %v2407_v49 = vpop.f32.mrf.mxu0 }
 0x3b4   :  { %v468_v50 = vrot.slane %v460_v48, %v2916_v20  ;;  %v2289_v53 = vmul.f32 -1.442695, %v453_v52 }
 0x3b6   :  { %469 = vrot.lane.b32.xlu0 %v468_v50, %s2764_s0  ;;  %2505 = vpow2.f32 %v2289_v53 }
 0x3c3   :  { %v2506_v54 = vpop.eup %2505 }
 0x3c4   :  { %v457_v55 = vadd.f32 1.0, %v2506_v54 }
 0x3c6   :  { %2507 = vrcp.f32 %v457_v55 }
 0x3d3   :  { %v2508_v56 = vpop.eup %2507 }
 0x3d4   :  { %v479_v62 = vsub.f32 1.0, %v2508_v56  ;;  %v485_v1 = vmul.f32 %v2508_v56, %v370_v44 }
 0x428   :  { %v470_v57 = vpop.permute.xlu0 %469 }
 0x429   :  { %v472_v58 = vmul.f32 %v2508_v56, %v470_v57 }
 0x42b   :  { %474 = vrot.lane.b32.xlu1 %v472_v58, %s2764_s0 }
 0x49d   :  { %v475_v59 = vpop.permute.xlu1 %474 }
 0x49e   :  { %v477_v60 = vadd.f32 %v475_v59, %v212_v51 }
 0x4a0   :  { %2509 = vtanh.f32 %v477_v60 }
 0x4ad   :  { %v2510_v61 = vpop.eup %2509 }
 0x4ae   :  { %481 = vrot.lane.b32.xlu0 %v2510_v61, %s2767_s4 }
 0x520   :  { %v482_v63 = vpop.permute.xlu0 %481 }
 0x521   :  { %v484_v3 = vmul.f32 %v482_v63, %v479_v62  ;;  %v221_v63 = vrot.slane %v2911_v18, %v2916_v20 }
 0x523   :  { %v486_v5 = vadd.f32 %v485_v1, %v484_v3 }
 0x525   :  { %v494_v6 = vrot.slane %v486_v5, %v2916_v20 }
 0x527   :  { %495 = vrot.lane.b32.xlu1 %v494_v6, %s2767_s4 }
 0x599   :  { %v496_v8 = vpop.permute.xlu1 %495 }
 0x59a   :  { %2417 = vmatmul.mubr.msk.f32.vlgmr.msra.gmra.mxu1 %vm245_vm3, %v496_v8 }
 0x59b   :  { %2431 = vmatpush3.msra.mxu1 %v2850_v2  ;;  %2438 = vmatprep.mubr.msk.f32.mxu1 %vm2763_vm0, %v2762_v0 }
 0x59c   :  { %2432 = vmatprep.subr.mxu1 %v2762_v0 }
 0x59d   :  { %2433 = vmatpush3.msra.mxu1 %v2857_v4 }
 0x59e   :  { %2434 = vmatprep.subr.mxu1 %v2762_v0 }
 0x59f   :  { %2435 = vmatpush3.msra.mxu1 %v2871_v7 }
 0x5a0   :  { %2436 = vmatprep.subr.mxu1 %v2762_v0 }
 0x5a1   :  { %2437 = vmatpush3.msra.mxu1 %v2877_v9 }
 0x5a2   :  { %2452 = vmatprep.subr.mxu1 %v2762_v0 }
 0x65a   :  { %v565_v10 = vpop.f32.mrf.mxu1 }
 0x65b   :  { %v576_v11 = vadd.f32 %v565_v10, %v2913_v19  ;;  %v569_v17 = vadd.f32 %v565_v10, %v211_v16 }
 0x65c   :  { %v2418_v12 = vpop.f32.mrf.mxu1 }
 0x65d   :  { %v584_v13 = vrot.slane %v576_v11, %v2916_v20  ;;  %v2291_v21 = vmul.f32 -1.442695, %v569_v17 }
 0x65f   :  { %585 = vrot.lane.b32.xlu0 %v584_v13, %s2764_s0  ;;  %2511 = vpow2.f32 %v2291_v21 }
 0x66c   :  { %v2512_v22 = vpop.eup %2511 }
 0x66d   :  { %v573_v23 = vadd.f32 1.0, %v2512_v22 }
 0x66f   :  { %2513 = vrcp.f32 %v573_v23 }
 0x67c   :  { %v2514_v24 = vpop.eup %2513 }
 0x67d   :  { %v595_v27 = vsub.f32 1.0, %v2514_v24  ;;  %v601_v32 = vmul.f32 %v2514_v24, %v486_v5 }
 0x6d1   :  { %v586_v25 = vpop.permute.xlu0 %585 }
 0x6d2   :  { %v588_v26 = vmul.f32 %v2514_v24, %v586_v25 }
 0x6d4   :  { %590 = vrot.lane.b32.xlu1 %v588_v26, %s2764_s0 }
 0x746   :  { %v591_v28 = vpop.permute.xlu1 %590 }
 0x747   :  { %v593_v29 = vadd.f32 %v591_v28, %v211_v16 }
 0x749   :  { %2515 = vtanh.f32 %v593_v29 }
 0x756   :  { %v2516_v30 = vpop.eup %2515 }
 0x757   :  { %597 = vrot.lane.b32.xlu0 %v2516_v30, %s2767_s4  ;;  %v229_v30 = vcombine.high %v221_v63, %v221_v63 }
 0x7c9   :  { %v598_v31 = vpop.permute.xlu0 %597 }
 0x7ca   :  { %v600_v33 = vmul.f32 %v598_v31, %v595_v27 }
 0x7cc   :  { %v602_v34 = vadd.f32 %v601_v32, %v600_v33 }
 0x7ce   :  { %v610_v35 = vrot.slane %v602_v34, %v2916_v20 }
 0x7d0   :  { %611 = vrot.lane.b32.xlu1 %v610_v35, %s2767_s4 }
 0x842   :  { %v612_v36 = vpop.permute.xlu1 %611 }
 0x843   :  { %2428 = vmatmul.mubr.msk.f32.vlgmr.msra.gmra.mxu0 %vm245_vm3, %v612_v36 }
 0x844   :  { %2442 = vmatpush3.msra.mxu0 %v2850_v2  ;;  %2449 = vmatprep.mubr.msk.f32.mxu0 %vm2763_vm0, %v2762_v0 }
 0x845   :  { %2443 = vmatprep.subr.mxu0 %v2762_v0 }
 0x846   :  { %2444 = vmatpush3.msra.mxu0 %v2857_v4 }
 0x847   :  { %2445 = vmatprep.subr.mxu0 %v2762_v0 }
 0x848   :  { %2446 = vmatpush3.msra.mxu0 %v2871_v7 }
 0x849   :  { %2447 = vmatprep.subr.mxu0 %v2762_v0 }
 0x84a   :  { %2448 = vmatpush3.msra.mxu0 %v2877_v9 }
 0x84b   :  { %2463 = vmatprep.subr.mxu0 %v2762_v0 }
 0x903   :  { %v681_v37 = vpop.f32.mrf.mxu0 }
 0x904   :  { %v692_v38 = vadd.f32 %v681_v37, %v2913_v19  ;;  %v685_v42 = vadd.f32 %v681_v37, %v213_v41 }
 0x905   :  { %v2429_v39 = vpop.f32.mrf.mxu0 }
 0x906   :  { %v700_v40 = vrot.slane %v692_v38, %v2916_v20  ;;  %v2293_v43 = vmul.f32 -1.442695, %v685_v42 }
 0x908   :  { %701 = vrot.lane.b32.xlu0 %v700_v40, %s2764_s0  ;;  %2517 = vpow2.f32 %v2293_v43 }
 0x915   :  { %v2518_v44 = vpop.eup %2517 }
 0x916   :  { %v689_v45 = vadd.f32 1.0, %v2518_v44 }
 0x918   :  { %2519 = vrcp.f32 %v689_v45 }
 0x925   :  { %v2520_v46 = vpop.eup %2519 }
 0x926   :  { %v711_v52 = vsub.f32 1.0, %v2520_v46  ;;  %v717_v54 = vmul.f32 %v2520_v46, %v602_v34 }
 0x97a   :  { %v702_v47 = vpop.permute.xlu0 %701 }
 0x97b   :  { %v704_v48 = vmul.f32 %v2520_v46, %v702_v47 }
 0x97d   :  { %706 = vrot.lane.b32.xlu1 %v704_v48, %s2764_s0  ;;  %v214_v48 = vcombine.high %v2911_v18, %v2911_v18 }
 0x9ef   :  { %v707_v49 = vpop.permute.xlu1 %706 }
 0x9f0   :  { %v709_v50 = vadd.f32 %v707_v49, %v213_v41  ;;  %v228_v49 = vrot.slane %v214_v48, %v2916_v20 }
 0x9f2   :  { %2521 = vtanh.f32 %v709_v50 }
 0x9ff   :  { %v2522_v51 = vpop.eup %2521 }
 0xa00   :  { %713 = vrot.lane.b32.xlu0 %v2522_v51, %s2767_s4 }
 0xa72   :  { %v714_v53 = vpop.permute.xlu0 %713 }
 0xa73   :  { %v716_v55 = vmul.f32 %v714_v53, %v711_v52 }
 0xa75   :  { %v718_v56 = vadd.f32 %v717_v54, %v716_v55 }
 0xa77   :  { %v726_v57 = vrot.slane %v718_v56, %v2916_v20 }
 0xa79   :  { %727 = vrot.lane.b32.xlu1 %v726_v57, %s2767_s4 }
 0xaeb   :  { %v728_v58 = vpop.permute.xlu1 %727 }
 0xaec   :  { %2439 = vmatmul.mubr.msk.f32.vlgmr.msra.gmra.mxu1 %vm245_vm3, %v728_v58 }
 0xaed   :  { %2453 = vmatpush3.msra.mxu1 %v2850_v2  ;;  %2460 = vmatprep.mubr.msk.f32.mxu1 %vm2763_vm0, %v2762_v0 }
 0xaee   :  { %2454 = vmatprep.subr.mxu1 %v2762_v0 }
 0xaef   :  { %2455 = vmatpush3.msra.mxu1 %v2857_v4 }
 0xaf0   :  { %2456 = vmatprep.subr.mxu1 %v2762_v0 }
 0xaf1   :  { %2457 = vmatpush3.msra.mxu1 %v2871_v7 }
 0xaf2   :  { %2458 = vmatprep.subr.mxu1 %v2762_v0 }
 0xaf3   :  { %2459 = vmatpush3.msra.mxu1 %v2877_v9 }
 0xbac   :  { %v797_v59 = vpop.f32.mrf.mxu1 }
 0xbad   :  { %v808_v60 = vadd.f32 %v797_v59, %v2913_v19  ;;  %v801_v1 = vadd.f32 %v797_v59, %v221_v63 }
 0xbae   :  { %v2440_v61 = vpop.f32.mrf.mxu1 }
 0xbaf   :  { %v816_v62 = vrot.slane %v808_v60, %v2916_v20  ;;  %v2295_v3 = vmul.f32 -1.442695, %v801_v1 }
 0xbb1   :  { %817 = vrot.lane.b32.xlu0 %v816_v62, %s2764_s0  ;;  %2523 = vpow2.f32 %v2295_v3 }
 0xbbe   :  { %v2524_v5 = vpop.eup %2523 }
 0xbbf   :  { %v805_v6 = vadd.f32 1.0, %v2524_v5 }
 0xbc1   :  { %2525 = vrcp.f32 %v805_v6 }
 0xbce   :  { %v2526_v8 = vpop.eup %2525 }
 0xbcf   :  { %v827_v16 = vsub.f32 1.0, %v2526_v8  ;;  %v833_v21 = vmul.f32 %v2526_v8, %v718_v56 }
 0xc23   :  { %v818_v10 = vpop.permute.xlu0 %817 }
 0xc24   :  { %v820_v11 = vmul.f32 %v2526_v8, %v818_v10 }
 0xc26   :  { %822 = vrot.lane.b32.xlu1 %v820_v11, %s2764_s0  ;;  %v230_v11 = vcombine.high %v228_v49, %v228_v49 }
 0xc98   :  { %v823_v12 = vpop.permute.xlu1 %822 }
 0xc99   :  { %v825_v13 = vadd.f32 %v823_v12, %v221_v63 }
 0xc9b   :  { %2527 = vtanh.f32 %v825_v13 }
 0xca8   :  { %v2528_v14 = vpop.eup %2527 }
 0xca9   :  { %829 = vrot.lane.b32.xlu0 %v2528_v14, %s2767_s4 }
 0xd1b   :  { %v830_v17 = vpop.permute.xlu0 %829 }
 0xd1c   :  { %v832_v22 = vmul.f32 %v830_v17, %v827_v16 }
 0xd1e   :  { %v834_v23 = vadd.f32 %v833_v21, %v832_v22 }
 0xd20   :  { %v842_v24 = vrot.slane %v834_v23, %v2916_v20 }
 0xd22   :  { %843 = vrot.lane.b32.xlu1 %v842_v24, %s2767_s4 }
 0xd94   :  { %v844_v25 = vpop.permute.xlu1 %843 }
 0xd95   :  { %2450 = vmatmul.mubr.msk.f32.vlgmr.msra.gmra.mxu0 %vm245_vm3, %v844_v25  ;;  %v3050_v25 = vld [vmem:[%s3304_s6 + $0x30] sm:$0xff] }
 0xd96   :  { %2464 = vmatpush3.msra.mxu0 %v2850_v2  ;;  %2471 = vmatprep.mubr.msk.f32.mxu0 %vm2763_vm0, %v2762_v0 }
 0xd97   :  { %2465 = vmatprep.subr.mxu0 %v2762_v0 }
 0xd98   :  { %2466 = vmatpush3.msra.mxu0 %v2857_v4 }
 0xd99   :  { %2467 = vmatprep.subr.mxu0 %v2762_v0 }
 0xd9a   :  { %2468 = vmatpush3.msra.mxu0 %v2871_v7 }
 0xd9b   :  { %2469 = vmatprep.subr.mxu0 %v2762_v0 }
 0xd9c   :  { %2470 = vmatpush3.msra.mxu0 %v2877_v9 }
 0xe55   :  { %v913_v26 = vpop.f32.mrf.mxu0 }
 0xe56   :  { %v924_v28 = vadd.f32 %v913_v26, %v2913_v19  ;;  %v917_v27 = vadd.f32 %v913_v26, %v229_v30  ;;  %v3055_v26 = vld [vmem:[%s3304_s6 + $0x28] sm:$0xff] }
 0xe57   :  { %v2451_v29 = vpop.f32.mrf.mxu0 }
 0xe58   :  { %v932_v2 = vrot.slane %v924_v28, %v2916_v20  ;;  %v2297_v31 = vmul.f32 -1.442695, %v917_v27  ;;  %v3061_v28 = vld [vmem:[%s3304_s6 + $0x20] sm:$0xff]  ;;  %v3068_v29 = vld [vmem:[%s3304_s6 + $0x18] sm:$0xff] }
 0xe59   :  { %v3089_v27 = vld [vmem:[%s3304_s6] sm:$0xff] }
 0xe5a   :  { %933 = vrot.lane.b32.xlu0 %v932_v2, %s2764_s0  ;;  %2529 = vpow2.f32 %v2297_v31  ;;  %v3075_v2 = vld [vmem:[%s3304_s6 + $0x10] sm:$0xff] }
 0xe67   :  { %v2530_v4 = vpop.eup %2529 }
 0xe68   :  { %v921_v32 = vadd.f32 1.0, %v2530_v4 }
 0xe6a   :  { %2531 = vrcp.f32 %v921_v32 }
 0xe77   :  { %v2532_v7 = vpop.eup %2531 }
 0xe78   :  { %v943_v37 = vsub.f32 1.0, %v2532_v7  ;;  %v949_v39 = vmul.f32 %v2532_v7, %v834_v23 }
 0xecc   :  { %v934_v33 = vpop.permute.xlu0 %933 }
 0xecd   :  { %v936_v34 = vmul.f32 %v2532_v7, %v934_v33 }
 0xecf   :  { %938 = vrot.lane.b32.xlu1 %v936_v34, %s2764_s0 }
 0xf41   :  { %v939_v9 = vpop.permute.xlu1 %938 }
 0xf42   :  { %v941_v35 = vadd.f32 %v939_v9, %v229_v30  ;;  %v3082_v30 = vld [vmem:[%s3304_s6 + $0x8] sm:$0xff] }
 0xf44   :  { %2533 = vtanh.f32 %v941_v35 }
 0xf51   :  { %v2534_v36 = vpop.eup %2533 }
 0xf52   :  { %945 = vrot.lane.b32.xlu0 %v2534_v36, %s2767_s4  ;;  %v1204_v36 = vld [vmem:[#allocation8] sm:$0x3] }
 0xfc4   :  { %v946_v38 = vpop.permute.xlu0 %945 }
 0xfc5   :  { %v948_v40 = vmul.f32 %v946_v38, %v943_v37  ;;  %v1212_v37 = vsub.s32 1, %v2906_v15 }
 0xfc7   :  { %v950_v41 = vadd.f32 %v949_v39, %v948_v40  ;;  %v3117_v39 = vrot.slane %v1204_v36, %v1212_v37 }
 0xfc9   :  { %v958_v42 = vrot.slane %v950_v41, %v2916_v20 }
 0xfcb   :  { %959 = vrot.lane.b32.xlu1 %v958_v42, %s2767_s4 }
0x103d   :  { %v960_v43 = vpop.permute.xlu1 %959 }
0x103e   :  { %2461 = vmatmul.mubr.msk.f32.vlgmr.msra.gmra.mxu1 %vm245_vm3, %v960_v43 }
0x103f   :  { %1282 = vmatprep.mubr.f32.mxu1 %v2762_v0 }
0x10fe   :  { %v1029_v44 = vpop.f32.mrf.mxu1 }
0x10ff   :  { %v1040_v45 = vadd.f32 %v1029_v44, %v2913_v19  ;;  %v1033_v50 = vadd.f32 %v1029_v44, %v228_v49 }
0x1100   :  { %v2462_v46 = vpop.f32.mrf.mxu1 }
0x1101   :  { %v1048_v47 = vrot.slane %v1040_v45, %v2916_v20  ;;  %v2299_v51 = vmul.f32 -1.442695, %v1033_v50 }
0x1103   :  { %1049 = vrot.lane.b32.xlu0 %v1048_v47, %s2764_s0  ;;  %2535 = vpow2.f32 %v2299_v51 }
0x1110   :  { %v2536_v52 = vpop.eup %2535 }
0x1111   :  { %v1037_v53 = vadd.f32 1.0, %v2536_v52 }
0x1113   :  { %2537 = vrcp.f32 %v1037_v53 }
0x1120   :  { %v2538_v54 = vpop.eup %2537 }
0x1121   :  { %v1059_v18 = vsub.f32 1.0, %v2538_v54  ;;  %v1065_v61 = vmul.f32 %v2538_v54, %v950_v41 }
0x1175   :  { %v1050_v55 = vpop.permute.xlu0 %1049 }
0x1176   :  { %v1052_v56 = vmul.f32 %v2538_v54, %v1050_v55 }
0x1178   :  { %1054 = vrot.lane.b32.xlu1 %v1052_v56, %s2764_s0 }
0x11ea   :  { %v1055_v57 = vpop.permute.xlu1 %1054 }
0x11eb   :  { %v1057_v58 = vadd.f32 %v1055_v57, %v228_v49 }
0x11ed   :  { %2539 = vtanh.f32 %v1057_v58 }
0x11fa   :  { %v2540_v59 = vpop.eup %2539 }
0x11fb   :  { %1061 = vrot.lane.b32.xlu0 %v2540_v59, %s2767_s4 }
0x126d   :  { %v1062_v60 = vpop.permute.xlu0 %1061 }
0x126e   :  { %v1064_v62 = vmul.f32 %v1062_v60, %v1059_v18 }
0x1270   :  { %v1066_v63 = vadd.f32 %v1065_v61, %v1064_v62 }
0x1272   :  { %v1074_v1 = vrot.slane %v1066_v63, %v2916_v20 }
0x1274   :  { %1075 = vrot.lane.b32.xlu1 %v1074_v1, %s2767_s4 }
0x12e6   :  { %v1076_v3 = vpop.permute.xlu1 %1075 }
0x12e7   :  { %2472 = vmatmul.mubr.msk.f32.vlgmr.msra.gmra.mxu0 %vm245_vm3, %v1076_v3 }
0x12e8   :  { %1398 = vmatprep.mubr.f32.mxu0 %v2762_v0 }
0x13a7   :  { %v1145_v5 = vpop.f32.mrf.mxu0 }
0x13a8   :  { %v1156_v6 = vadd.f32 %v1145_v5, %v2913_v19  ;;  %v1149_v12 = vadd.f32 %v1145_v5, %v230_v11  ;;  %v3045_v19 = vld [vmem:[%s3304_s6 + $0x38] sm:$0xff] }
0x13a9   :  { %v2473_v8 = vpop.f32.mrf.mxu0  ;;  %1242 = vmatprep.subr.mxu1 %v3045_v19  ;;  %1358 = vmatprep.subr.mxu0 %v3045_v19 }
0x13aa   :  { %v1164_v10 = vrot.slane %v1156_v6, %v2916_v20  ;;  %v2301_v13 = vmul.f32 -1.442695, %v1149_v12  ;;  %1243 = vmatpush1.msra.mxu1 %v3050_v25  ;;  %1359 = vmatpush1.msra.mxu0 %v3050_v25 }
0x13ab   :  { %1244 = vmatprep.subr.mxu1 %v3055_v26  ;;  %1360 = vmatprep.subr.mxu0 %v3055_v26 }
0x13ac   :  { %1165 = vrot.lane.b32.xlu0 %v1164_v10, %s2764_s0  ;;  %2541 = vpow2.f32 %v2301_v13  ;;  %1245 = vmatpush1.msra.mxu1 %v3061_v28 }
0x13ad   :  { %1361 = vmatpush1.msra.mxu0 %v3061_v28  ;;  %1246 = vmatprep.subr.mxu1 %v3068_v29 }
0x13ae   :  { %1362 = vmatprep.subr.mxu0 %v3068_v29  ;;  %1247 = vmatpush1.msra.mxu1 %v3075_v2 }
0x13af   :  { %1363 = vmatpush1.msra.mxu0 %v3075_v2  ;;  %1248 = vmatprep.subr.mxu1 %v3082_v30 }
0x13b0   :  { %1249 = vmatpush1.msra.mxu1 %v3089_v27  ;;  %1364 = vmatprep.subr.mxu0 %v3082_v30 }
0x13b1   :  { %1365 = vmatpush1.msra.mxu0 %v3089_v27  ;;  %1474 = vmatprep.subr.mxu1 %v3045_v19 }
0x13b2   :  { %1590 = vmatprep.subr.mxu0 %v3045_v19 }
0x13b9   :  { %v2542_v14 = vpop.eup %2541 }
0x13ba   :  { %v1153_v16 = vadd.f32 1.0, %v2542_v14 }
0x13bc   :  { %2543 = vrcp.f32 %v1153_v16 }
0x13c9   :  { %v2544_v17 = vpop.eup %2543 }
0x13ca   :  { %v1175_v4 = vsub.f32 1.0, %v2544_v17  ;;  %v1181_v7 = vmul.f32 %v2544_v17, %v1066_v63 }
0x141e   :  { %v1166_v21 = vpop.permute.xlu0 %1165 }
0x141f   :  { %v1168_v22 = vmul.f32 %v2544_v17, %v1166_v21 }
0x1421   :  { %1170 = vrot.lane.b32.xlu1 %v1168_v22, %s2764_s0 }
0x1493   :  { %v1171_v23 = vpop.permute.xlu1 %1170 }
0x1494   :  { %v1173_v24 = vadd.f32 %v1171_v23, %v230_v11 }
0x1496   :  { %2545 = vtanh.f32 %v1173_v24 }
0x14a3   :  { %v2546_v31 = vpop.eup %2545 }
0x14a4   :  { %1177 = vrot.lane.b32.xlu0 %v2546_v31, %s2767_s4 }
0x1516   :  { %v1178_v32 = vpop.permute.xlu0 %1177 }
0x1517   :  { %v1180_v33 = vmul.f32 %v1178_v32, %v1175_v4 }
0x1519   :  { %v1182_v34 = vadd.f32 %v1181_v7, %v1180_v33 }
0x151b   :  { %v1190_v9 = vrot.slane %v1182_v34, %v2916_v20  ;;  %v1208_v20 = vsub.s32 0, %v2906_v15 }
0x151d   :  { %1191 = vrot.lane.b32.xlu1 %v1190_v9, %s2767_s4  ;;  %v3115_v38 = vrot.slane %v1204_v36, %v1208_v20 }
0x158f   :  { %v1192_v35 = vpop.permute.xlu1 %1191 }
0x1590   :  { %2302 = vmatmul.mubr.msk.f32.vlgmr.msra.gmra.mxu1 %vm245_vm3, %v1192_v35  ;;  %1195 = vst.msk [vmem:[#allocation11] sm:$0x3] %vm1194_vm4, %v1192_v35 }
0x1591   :  { %1475 = vmatpush1.msra.mxu1 %v3050_v25  ;;  %1514 = vmatprep.mubr.f32.mxu1 %v2762_v0 }
0x1592   :  { %1476 = vmatprep.subr.mxu1 %v3055_v26 }
0x1593   :  { %1477 = vmatpush1.msra.mxu1 %v3061_v28 }
0x1594   :  { %1478 = vmatprep.subr.mxu1 %v3068_v29 }
0x1595   :  { %1479 = vmatpush1.msra.mxu1 %v3075_v2 }
0x1596   :  { %1480 = vmatprep.subr.mxu1 %v3082_v30 }
0x1597   :  { %1481 = vmatpush1.msra.mxu1 %v3089_v27 }
0x1598   :  { %1706 = vmatprep.subr.mxu1 %v3045_v19 }
0x1650   :  { %v1284_v40 = vpop.f32.mrf.mxu1 }
0x1651   :  { %v1285_v41 = vadd.f32 %v1284_v40, %v3115_v38 }
0x1652   :  { %v1286_v42 = vpop.f32.mrf.mxu1 }
0x1653   :  { %v1287_v43 = vadd.f32 %v1286_v42, %v3117_v39  ;;  %1290 = vrot.lane.b32.xlu0 %v1285_v41, %s2766_s15 }
0x1655   :  { %1311 = vrot.lane.b32.xlu1 %v1287_v43, %s2767_s4 }
0x1659   :  { %1301 = vrot.lane.b32.xlu1 %v1287_v43, %s2766_s15 }
0x16c5   :  { %v1291_v44 = vpop.permute.xlu0 %1290 }
0x16c6   :  { %v1293_v45 = vadd.f32 %v1291_v44, %v1285_v41 }
0x16c7   :  { %v1312_v49 = vpop.permute.xlu1 %1311 }
0x16c8   :  { %v2303_v46 = vmul.f32 -1.442695, %v1293_v45 }
0x16ca   :  { %2547 = vpow2.f32 %v2303_v46 }
0x16cb   :  { %v1302_v54 = vpop.permute.xlu1 %1301 }
0x16cc   :  { %v1304_v55 = vadd.f32 %v1302_v54, %v1285_v41 }
0x16ce   :  { %v2304_v56 = vmul.f32 -1.442695, %v1304_v55 }
0x16d7   :  { %v2548_v15 = vpop.eup %2547 }
0x16d8   :  { %v1297_v47 = vadd.f32 1.0, %v2548_v15 }
0x16da   :  { %2549 = vrcp.f32 %v1297_v47 }
0x16e7   :  { %v2550_v48 = vpop.eup %2549 }
0x16e8   :  { %v1314_v50 = vmul.f32 %v2550_v48, %v1312_v49 }
0x16ea   :  { %1316 = vrot.lane.b32.xlu0 %v1314_v50, %s2764_s0 }
0x175c   :  { %v1317_v51 = vpop.permute.xlu0 %1316 }
0x175d   :  { %v1319_v52 = vadd.f32 %v1317_v51, %v1285_v41 }
0x175f   :  { %2551 = vtanh.f32 %v1319_v52 }
0x1760   :  { %2553 = vpow2.f32 %v2304_v56 }
0x176c   :  { %v2552_v53 = vpop.eup %2551 }
0x176d   :  { %1323 = vrot.lane.b32.xlu0 %v2552_v53, %s2767_s4  ;;  %v2554_v57 = vpop.eup %2553 }
0x176e   :  { %v1308_v58 = vadd.f32 1.0, %v2554_v57 }
0x1770   :  { %2555 = vrcp.f32 %v1308_v58 }
0x177d   :  { %v2556_v59 = vpop.eup %2555 }
0x177e   :  { %v1321_v18 = vsub.f32 1.0, %v2556_v59  ;;  %v1327_v62 = vmul.f32 %v2556_v59, %v1182_v34 }
0x17df   :  { %v1324_v60 = vpop.permute.xlu0 %1323 }
0x17e0   :  { %v1326_v61 = vmul.f32 %v1324_v60, %v1321_v18 }
0x17e2   :  { %v3126_v63 = vadd.f32 %v1327_v62, %v1326_v61 }
0x17e4   :  { %1330 = vrot.lane.b32.xlu1 %v3126_v63, %s2767_s4 }
0x1856   :  { %v1331_v1 = vpop.permute.xlu1 %1330 }
0x1857   :  { %2305 = vmatmul.mubr.msk.f32.vlgmr.msra.gmra.mxu0 %vm245_vm3, %v1331_v1 }
0x1858   :  { %1591 = vmatpush1.msra.mxu0 %v3050_v25  ;;  %1630 = vmatprep.mubr.f32.mxu0 %v2762_v0 }
0x1859   :  { %1592 = vmatprep.subr.mxu0 %v3055_v26 }
0x185a   :  { %1593 = vmatpush1.msra.mxu0 %v3061_v28 }
0x185b   :  { %1594 = vmatprep.subr.mxu0 %v3068_v29 }
0x185c   :  { %1595 = vmatpush1.msra.mxu0 %v3075_v2 }
0x185d   :  { %1596 = vmatprep.subr.mxu0 %v3082_v30 }
0x185e   :  { %1597 = vmatpush1.msra.mxu0 %v3089_v27 }
0x185f   :  { %1822 = vmatprep.subr.mxu0 %v3045_v19 }
0x1917   :  { %v1400_v3 = vpop.f32.mrf.mxu0 }
0x1918   :  { %v1401_v5 = vadd.f32 %v1400_v3, %v3115_v38 }
0x1919   :  { %v1402_v6 = vpop.f32.mrf.mxu0 }
0x191a   :  { %v1403_v8 = vadd.f32 %v1402_v6, %v3117_v39  ;;  %1406 = vrot.lane.b32.xlu0 %v1401_v5, %s2766_s15 }
0x191c   :  { %1427 = vrot.lane.b32.xlu1 %v1403_v8, %s2767_s4 }
0x1920   :  { %1417 = vrot.lane.b32.xlu1 %v1403_v8, %s2766_s15 }
0x198c   :  { %v1407_v10 = vpop.permute.xlu0 %1406 }
0x198d   :  { %v1409_v11 = vadd.f32 %v1407_v10, %v1401_v5 }
0x198e   :  { %v1428_v17 = vpop.permute.xlu1 %1427 }
0x198f   :  { %v2306_v12 = vmul.f32 -1.442695, %v1409_v11 }
0x1991   :  { %2557 = vpow2.f32 %v2306_v12 }
0x1992   :  { %v1418_v31 = vpop.permute.xlu1 %1417 }
0x1993   :  { %v1420_v4 = vadd.f32 %v1418_v31, %v1401_v5 }
0x1995   :  { %v2307_v32 = vmul.f32 -1.442695, %v1420_v4 }
0x199e   :  { %v2558_v13 = vpop.eup %2557 }
0x199f   :  { %v1413_v14 = vadd.f32 1.0, %v2558_v13 }
0x19a1   :  { %2559 = vrcp.f32 %v1413_v14 }
0x19ae   :  { %v2560_v16 = vpop.eup %2559 }
0x19af   :  { %v1430_v21 = vmul.f32 %v2560_v16, %v1428_v17 }
0x19b1   :  { %1432 = vrot.lane.b32.xlu0 %v1430_v21, %s2764_s0 }
0x1a23   :  { %v1433_v22 = vpop.permute.xlu0 %1432 }
0x1a24   :  { %v1435_v23 = vadd.f32 %v1433_v22, %v1401_v5 }
0x1a26   :  { %2561 = vtanh.f32 %v1435_v23 }
0x1a27   :  { %2563 = vpow2.f32 %v2307_v32 }
0x1a33   :  { %v2562_v24 = vpop.eup %2561 }
0x1a34   :  { %1439 = vrot.lane.b32.xlu0 %v2562_v24, %s2767_s4  ;;  %v2564_v7 = vpop.eup %2563 }
0x1a35   :  { %v1424_v33 = vadd.f32 1.0, %v2564_v7 }
0x1a37   :  { %2565 = vrcp.f32 %v1424_v33 }
0x1a44   :  { %v2566_v34 = vpop.eup %2565 }
0x1a45   :  { %v1437_v9 = vsub.f32 1.0, %v2566_v34  ;;  %v1443_v36 = vmul.f32 %v2566_v34, %v3126_v63 }
0x1aa6   :  { %v1440_v35 = vpop.permute.xlu0 %1439 }
0x1aa7   :  { %v1442_v20 = vmul.f32 %v1440_v35, %v1437_v9 }
0x1aa9   :  { %v3148_v37 = vadd.f32 %v1443_v36, %v1442_v20 }
0x1aab   :  { %1446 = vrot.lane.b32.xlu1 %v3148_v37, %s2767_s4 }
0x1b1d   :  { %v1447_v40 = vpop.permute.xlu1 %1446 }
0x1b1e   :  { %2308 = vmatmul.mubr.msk.f32.vlgmr.msra.gmra.mxu1 %vm245_vm3, %v1447_v40 }
0x1b1f   :  { %1707 = vmatpush1.msra.mxu1 %v3050_v25  ;;  %1746 = vmatprep.mubr.f32.mxu1 %v2762_v0 }
0x1b20   :  { %1708 = vmatprep.subr.mxu1 %v3055_v26 }
0x1b21   :  { %1709 = vmatpush1.msra.mxu1 %v3061_v28 }
0x1b22   :  { %1710 = vmatprep.subr.mxu1 %v3068_v29 }
0x1b23   :  { %1711 = vmatpush1.msra.mxu1 %v3075_v2 }
0x1b24   :  { %1712 = vmatprep.subr.mxu1 %v3082_v30 }
0x1b25   :  { %1713 = vmatpush1.msra.mxu1 %v3089_v27 }
0x1b26   :  { %1938 = vmatprep.subr.mxu1 %v3045_v19 }
0x1bde   :  { %v1516_v41 = vpop.f32.mrf.mxu1 }
0x1bdf   :  { %v1517_v42 = vadd.f32 %v1516_v41, %v3115_v38 }
0x1be0   :  { %v1518_v43 = vpop.f32.mrf.mxu1 }
0x1be1   :  { %v1519_v44 = vadd.f32 %v1518_v43, %v3117_v39  ;;  %1522 = vrot.lane.b32.xlu0 %v1517_v42, %s2766_s15 }
0x1be3   :  { %1543 = vrot.lane.b32.xlu1 %v1519_v44, %s2767_s4 }
0x1be7   :  { %1533 = vrot.lane.b32.xlu1 %v1519_v44, %s2766_s15 }
0x1c53   :  { %v1523_v45 = vpop.permute.xlu0 %1522 }
0x1c54   :  { %v1525_v46 = vadd.f32 %v1523_v45, %v1517_v42 }
0x1c55   :  { %v1544_v50 = vpop.permute.xlu1 %1543 }
0x1c56   :  { %v2309_v15 = vmul.f32 -1.442695, %v1525_v46 }
0x1c58   :  { %2567 = vpow2.f32 %v2309_v15 }
0x1c59   :  { %v1534_v55 = vpop.permute.xlu1 %1533 }
0x1c5a   :  { %v1536_v56 = vadd.f32 %v1534_v55, %v1517_v42 }
0x1c5c   :  { %v2310_v57 = vmul.f32 -1.442695, %v1536_v56 }
0x1c65   :  { %v2568_v47 = vpop.eup %2567 }
0x1c66   :  { %v1529_v48 = vadd.f32 1.0, %v2568_v47 }
0x1c68   :  { %2569 = vrcp.f32 %v1529_v48 }
0x1c75   :  { %v2570_v49 = vpop.eup %2569 }
0x1c76   :  { %v1546_v51 = vmul.f32 %v2570_v49, %v1544_v50 }
0x1c78   :  { %1548 = vrot.lane.b32.xlu0 %v1546_v51, %s2764_s0 }
0x1cea   :  { %v1549_v52 = vpop.permute.xlu0 %1548 }
0x1ceb   :  { %v1551_v53 = vadd.f32 %v1549_v52, %v1517_v42 }
0x1ced   :  { %2571 = vtanh.f32 %v1551_v53 }
0x1cee   :  { %2573 = vpow2.f32 %v2310_v57 }
0x1cfa   :  { %v2572_v54 = vpop.eup %2571 }
0x1cfb   :  { %1555 = vrot.lane.b32.xlu0 %v2572_v54, %s2767_s4  ;;  %v2574_v58 = vpop.eup %2573 }
0x1cfc   :  { %v1540_v59 = vadd.f32 1.0, %v2574_v58 }
0x1cfe   :  { %2575 = vrcp.f32 %v1540_v59 }
0x1d0b   :  { %v2576_v18 = vpop.eup %2575 }
0x1d0c   :  { %v1553_v60 = vsub.f32 1.0, %v2576_v18  ;;  %v1559_v1 = vmul.f32 %v2576_v18, %v3148_v37 }
0x1d6d   :  { %v1556_v61 = vpop.permute.xlu0 %1555 }
0x1d6e   :  { %v1558_v62 = vmul.f32 %v1556_v61, %v1553_v60 }
0x1d70   :  { %v3170_v3 = vadd.f32 %v1559_v1, %v1558_v62 }
0x1d72   :  { %1562 = vrot.lane.b32.xlu1 %v3170_v3, %s2767_s4 }
0x1de4   :  { %v1563_v5 = vpop.permute.xlu1 %1562 }
0x1de5   :  { %2311 = vmatmul.mubr.msk.f32.vlgmr.msra.gmra.mxu0 %vm245_vm3, %v1563_v5 }
0x1de6   :  { %1823 = vmatpush1.msra.mxu0 %v3050_v25  ;;  %1862 = vmatprep.mubr.f32.mxu0 %v2762_v0 }
0x1de7   :  { %1824 = vmatprep.subr.mxu0 %v3055_v26 }
0x1de8   :  { %1825 = vmatpush1.msra.mxu0 %v3061_v28 }
0x1de9   :  { %1826 = vmatprep.subr.mxu0 %v3068_v29 }
0x1dea   :  { %1827 = vmatpush1.msra.mxu0 %v3075_v2 }
0x1deb   :  { %1828 = vmatprep.subr.mxu0 %v3082_v30 }
0x1dec   :  { %1829 = vmatpush1.msra.mxu0 %v3089_v27 }
0x1ded   :  { %2054 = vmatprep.subr.mxu0 %v3045_v19 }
0x1ea5   :  { %v1632_v6 = vpop.f32.mrf.mxu0 }
0x1ea6   :  { %v1633_v8 = vadd.f32 %v1632_v6, %v3115_v38 }
0x1ea7   :  { %v1634_v10 = vpop.f32.mrf.mxu0 }
0x1ea8   :  { %v1635_v11 = vadd.f32 %v1634_v10, %v3117_v39  ;;  %1638 = vrot.lane.b32.xlu0 %v1633_v8, %s2766_s15 }
0x1eaa   :  { %1659 = vrot.lane.b32.xlu1 %v1635_v11, %s2767_s4 }
0x1eae   :  { %1649 = vrot.lane.b32.xlu1 %v1635_v11, %s2766_s15 }
0x1f1a   :  { %v1639_v12 = vpop.permute.xlu0 %1638 }
0x1f1b   :  { %v1641_v13 = vadd.f32 %v1639_v12, %v1633_v8 }
0x1f1c   :  { %v1660_v21 = vpop.permute.xlu1 %1659 }
0x1f1d   :  { %v2312_v14 = vmul.f32 -1.442695, %v1641_v13 }
0x1f1f   :  { %2577 = vpow2.f32 %v2312_v14 }
0x1f20   :  { %v1650_v4 = vpop.permute.xlu1 %1649 }
0x1f21   :  { %v1652_v32 = vadd.f32 %v1650_v4, %v1633_v8 }
0x1f23   :  { %v2313_v7 = vmul.f32 -1.442695, %v1652_v32 }
0x1f2c   :  { %v2578_v16 = vpop.eup %2577 }
0x1f2d   :  { %v1645_v17 = vadd.f32 1.0, %v2578_v16 }
0x1f2f   :  { %2579 = vrcp.f32 %v1645_v17 }
0x1f3c   :  { %v2580_v19 = vpop.eup %2579 }
0x1f3d   :  { %v1662_v22 = vmul.f32 %v2580_v19, %v1660_v21 }
0x1f3f   :  { %1664 = vrot.lane.b32.xlu0 %v1662_v22, %s2764_s0 }
0x1fb1   :  { %v1665_v23 = vpop.permute.xlu0 %1664 }
0x1fb2   :  { %v1667_v24 = vadd.f32 %v1665_v23, %v1633_v8 }
0x1fb4   :  { %2581 = vtanh.f32 %v1667_v24 }
0x1fb5   :  { %2583 = vpow2.f32 %v2313_v7 }
0x1fc1   :  { %v2582_v31 = vpop.eup %2581 }
0x1fc2   :  { %1671 = vrot.lane.b32.xlu0 %v2582_v31, %s2767_s4  ;;  %v2584_v33 = vpop.eup %2583 }
0x1fc3   :  { %v1656_v34 = vadd.f32 1.0, %v2584_v33 }
0x1fc5   :  { %2585 = vrcp.f32 %v1656_v34 }
0x1fd2   :  { %v2586_v9 = vpop.eup %2585 }
0x1fd3   :  { %v1669_v35 = vsub.f32 1.0, %v2586_v9  ;;  %v1675_v40 = vmul.f32 %v2586_v9, %v3170_v3 }
0x2034   :  { %v1672_v20 = vpop.permute.xlu0 %1671 }
0x2035   :  { %v1674_v36 = vmul.f32 %v1672_v20, %v1669_v35 }
0x2037   :  { %v3192_v41 = vadd.f32 %v1675_v40, %v1674_v36 }
0x2039   :  { %1678 = vrot.lane.b32.xlu1 %v3192_v41, %s2767_s4 }
0x20ab   :  { %v1679_v42 = vpop.permute.xlu1 %1678 }
0x20ac   :  { %2314 = vmatmul.mubr.msk.f32.vlgmr.msra.gmra.mxu1 %vm245_vm3, %v1679_v42 }
0x20ad   :  { %1939 = vmatpush1.msra.mxu1 %v3050_v25  ;;  %1978 = vmatprep.mubr.f32.mxu1 %v2762_v0 }
0x20ae   :  { %1940 = vmatprep.subr.mxu1 %v3055_v26 }
0x20af   :  { %1941 = vmatpush1.msra.mxu1 %v3061_v28 }
0x20b0   :  { %1942 = vmatprep.subr.mxu1 %v3068_v29 }
0x20b1   :  { %1943 = vmatpush1.msra.mxu1 %v3075_v2 }
0x20b2   :  { %1944 = vmatprep.subr.mxu1 %v3082_v30 }
0x20b3   :  { %1945 = vmatpush1.msra.mxu1 %v3089_v27 }
0x216c   :  { %v1748_v43 = vpop.f32.mrf.mxu1 }
0x216d   :  { %v1749_v44 = vadd.f32 %v1748_v43, %v3115_v38 }
0x216e   :  { %v1750_v45 = vpop.f32.mrf.mxu1 }
0x216f   :  { %v1751_v46 = vadd.f32 %v1750_v45, %v3117_v39  ;;  %1754 = vrot.lane.b32.xlu0 %v1749_v44, %s2766_s15 }
0x2171   :  { %1775 = vrot.lane.b32.xlu1 %v1751_v46, %s2767_s4 }
0x2175   :  { %1765 = vrot.lane.b32.xlu1 %v1751_v46, %s2766_s15 }
0x21e1   :  { %v1755_v15 = vpop.permute.xlu0 %1754 }
0x21e2   :  { %v1757_v47 = vadd.f32 %v1755_v15, %v1749_v44 }
0x21e3   :  { %v1776_v52 = vpop.permute.xlu1 %1775 }
0x21e4   :  { %v2315_v48 = vmul.f32 -1.442695, %v1757_v47 }
0x21e6   :  { %2587 = vpow2.f32 %v2315_v48 }
0x21e7   :  { %v1766_v57 = vpop.permute.xlu1 %1765 }
0x21e8   :  { %v1768_v58 = vadd.f32 %v1766_v57, %v1749_v44 }
0x21ea   :  { %v2316_v59 = vmul.f32 -1.442695, %v1768_v58 }
0x21f3   :  { %v2588_v49 = vpop.eup %2587 }
0x21f4   :  { %v1761_v50 = vadd.f32 1.0, %v2588_v49 }
0x21f6   :  { %2589 = vrcp.f32 %v1761_v50 }
0x2203   :  { %v2590_v51 = vpop.eup %2589 }
0x2204   :  { %v1778_v53 = vmul.f32 %v2590_v51, %v1776_v52 }
0x2206   :  { %1780 = vrot.lane.b32.xlu0 %v1778_v53, %s2764_s0 }
0x2278   :  { %v1781_v54 = vpop.permute.xlu0 %1780 }
0x2279   :  { %v1783_v55 = vadd.f32 %v1781_v54, %v1749_v44 }
0x227b   :  { %2591 = vtanh.f32 %v1783_v55 }
0x227c   :  { %2593 = vpow2.f32 %v2316_v59 }
0x2288   :  { %v2592_v56 = vpop.eup %2591 }
0x2289   :  { %1787 = vrot.lane.b32.xlu0 %v2592_v56, %s2767_s4  ;;  %v2594_v18 = vpop.eup %2593 }
0x228a   :  { %v1772_v60 = vadd.f32 1.0, %v2594_v18 }
0x228c   :  { %2595 = vrcp.f32 %v1772_v60 }
0x2299   :  { %v2596_v61 = vpop.eup %2595 }
0x229a   :  { %v1785_v62 = vsub.f32 1.0, %v2596_v61  ;;  %v1791_v6 = vmul.f32 %v2596_v61, %v3192_v41 }
0x22fb   :  { %v1788_v1 = vpop.permute.xlu0 %1787 }
0x22fc   :  { %v1790_v5 = vmul.f32 %v1788_v1, %v1785_v62 }
0x22fe   :  { %v3213_v8 = vadd.f32 %v1791_v6, %v1790_v5 }
0x2300   :  { %1794 = vrot.lane.b32.xlu1 %v3213_v8, %s2767_s4 }
0x2372   :  { %v1795_v10 = vpop.permute.xlu1 %1794 }
0x2373   :  { %2317 = vmatmul.mubr.msk.f32.vlgmr.msra.gmra.mxu0 %vm245_vm3, %v1795_v10 }
0x2374   :  { %2055 = vmatpush1.msra.mxu0 %v3050_v25  ;;  %2094 = vmatprep.mubr.f32.mxu0 %v2762_v0 }
0x2375   :  { %2056 = vmatprep.subr.mxu0 %v3055_v26 }
0x2376   :  { %2057 = vmatpush1.msra.mxu0 %v3061_v28 }
0x2377   :  { %2058 = vmatprep.subr.mxu0 %v3068_v29 }
0x2378   :  { %2059 = vmatpush1.msra.mxu0 %v3075_v2 }
0x2379   :  { %2060 = vmatprep.subr.mxu0 %v3082_v30 }
0x237a   :  { %2061 = vmatpush1.msra.mxu0 %v3089_v27 }
0x2433   :  { %v1864_v11 = vpop.f32.mrf.mxu0 }
0x2434   :  { %v1865_v12 = vadd.f32 %v1864_v11, %v3115_v38 }
0x2435   :  { %v1866_v13 = vpop.f32.mrf.mxu0 }
0x2436   :  { %v1867_v25 = vadd.f32 %v1866_v13, %v3117_v39  ;;  %1870 = vrot.lane.b32.xlu0 %v1865_v12, %s2766_s15 }
0x2438   :  { %1891 = vrot.lane.b32.xlu1 %v1867_v25, %s2767_s4 }
0x243c   :  { %1881 = vrot.lane.b32.xlu1 %v1867_v25, %s2766_s15 }
0x24a8   :  { %v1871_v0 = vpop.permute.xlu0 %1870 }
0x24a9   :  { %v1873_v26 = vadd.f32 %v1871_v0, %v1865_v12 }
0x24aa   :  { %v1892_v27 = vpop.permute.xlu1 %1891 }
0x24ab   :  { %v2318_v28 = vmul.f32 -1.442695, %v1873_v26 }
0x24ad   :  { %2597 = vpow2.f32 %v2318_v28 }
0x24ae   :  { %v1882_v21 = vpop.permute.xlu1 %1881 }
0x24af   :  { %v1884_v22 = vadd.f32 %v1882_v21, %v1865_v12  ;;  %v2161_v21 = vld [vmem:[%s3306_s8] sm:$0xff] }
0x24b1   :  { %v2319_v23 = vmul.f32 -1.442695, %v1884_v22 }
0x24ba   :  { %v2598_v29 = vpop.eup %2597 }
0x24bb   :  { %v1877_v2 = vadd.f32 1.0, %v2598_v29 }
0x24bd   :  { %2599 = vrcp.f32 %v1877_v2 }
0x24ca   :  { %v2600_v30 = vpop.eup %2599 }
0x24cb   :  { %v1894_v14 = vmul.f32 %v2600_v30, %v1892_v27  ;;  %v2164_v30 = vld [vmem:[%s3306_s8 + $0x18] sm:$0xff]  ;;  %v2163_v27 = vld [vmem:[%s3306_s8 + $0x10] sm:$0xff] }
0x24cc   :  { %2474 = vmatprep.subr.mxu1 %v2164_v30 }
0x24cd   :  { %1896 = vrot.lane.b32.xlu0 %v1894_v14, %s2764_s0  ;;  %v2147_v14 = vrot.slane %v3170_v3, 6 }
0x253f   :  { %v1897_v16 = vpop.permute.xlu0 %1896 }
0x2540   :  { %v1899_v17 = vadd.f32 %v1897_v16, %v1865_v12  ;;  %v2162_v16 = vld [vmem:[%s3306_s8 + $0x8] sm:$0xff]  ;;  %s2768_s8 = smov [#allocation11]  }
0x2541   :  { %s2268_s3 = sshll.u32 %s2768_s8, 4  ;;  %s2269_s3 = int_to_ptr.vmem [resolvable:$true] %s2268_s3 }
0x2542   :  { %2601 = vtanh.f32 %v1899_v17  ;;  %v2158_v17 = vsel %vm2153_vm5, %v3192_v41, %v2147_v14  ;;  %s2727_s14 = scalar_lea.vmem %s2269_s3, 32  ;;  %p2732_p12 = scmp.lt.s32.totalorder %s2269_s3, %s2269_s3 }
0x2543   :  { %2603 = vpow2.f32 %v2319_v23  ;;  %v2151_v23 = vrot.slane %v3126_v63, 2  ;;  %p2728_p11 = scmp.ne.s32.totalorder %s2269_s3, %s2727_s14  ;;  %p2733_p13 = scmp.lt.s32.totalorder %s2727_s14, %s2727_s14 }
0x2545   :  { %p2734_p0 = por %p2733_p13, %p2732_p12 }
0x2547   :  { %p2735_p1 = pnand %p2734_p0, %p2728_p11 }
0x254f   :  { %v2602_v19 = vpop.eup %2601 }
0x2550   :  { %1903 = vrot.lane.b32.xlu0 %v2602_v19, %s2767_s4  ;;  %v2604_v24 = vpop.eup %2603  ;;  %v2149_v19 = vrot.slane %v3148_v37, 4 }
0x2551   :  { %v1888_v31 = vadd.f32 1.0, %v2604_v24 }
0x2552   :  { %v2159_v3 = vsel %vm116_vm1, %v2158_v17, %v2149_v19 }
0x2553   :  { %2605 = vrcp.f32 %v1888_v31  ;;  %v2160_v41 = vsel %vm2156_vm6, %v2159_v3, %v2151_v23 }
0x2560   :  { %v2606_v4 = vpop.eup %2605 }
0x2561   :  { %v1901_v32 = vsub.f32 1.0, %v2606_v4  ;;  %v1907_v34 = vmul.f32 %v2606_v4, %v3213_v8 }
0x25c2   :  { %v1904_v7 = vpop.permute.xlu0 %1903 }
0x25c3   :  { %v1906_v33 = vmul.f32 %v1904_v7, %v1901_v32 }
0x25c5   :  { %v3234_v9 = vadd.f32 %v1907_v34, %v1906_v33 }
0x25c7   :  { %1910 = vrot.lane.b32.xlu1 %v3234_v9, %s2767_s4 }
0x2639   :  { %v1911_v35 = vpop.permute.xlu1 %1910 }
0x263a   :  { %2320 = vmatmul.mubr.msk.f32.vlgmr.msra.gmra.mxu1 %vm245_vm3, %v1911_v35 }
0x263b   :  { %2475 = vmatpush3.msra.mxu1 %v2164_v30 }
0x263c   :  { %2476 = vmatprep.subr.mxu1 %v2163_v27 }
0x263d   :  { %2477 = vmatpush3.msra.mxu1 %v2163_v27 }
0x263e   :  { %2478 = vmatprep.subr.mxu1 %v2162_v16 }
0x263f   :  { %2479 = vmatpush3.msra.mxu1 %v2162_v16 }
0x2640   :  { %2480 = vmatprep.subr.mxu1 %v2161_v21 }
0x2641   :  { %2481 = vmatpush3.msra.mxu1 %v2161_v21 }
0x26fa   :  { %v1980_v20 = vpop.f32.mrf.mxu1 }
0x26fb   :  { %v1981_v36 = vadd.f32 %v1980_v20, %v3115_v38 }
0x26fc   :  { %v1982_v40 = vpop.f32.mrf.mxu1 }
0x26fd   :  { %v1983_v42 = vadd.f32 %v1982_v40, %v3117_v39  ;;  %1986 = vrot.lane.b32.xlu0 %v1981_v36, %s2766_s15  ;;  %v2143_v40 = vrot.slane %v3234_v9, 4 }
0x26ff   :  { %2007 = vrot.lane.b32.xlu1 %v1983_v42, %s2767_s4 }
0x2703   :  { %1997 = vrot.lane.b32.xlu1 %v1983_v42, %s2766_s15  ;;  %v2145_v42 = vrot.slane %v3213_v8, 2 }
0x276f   :  { %v1987_v43 = vpop.permute.xlu0 %1986 }
0x2770   :  { %v1989_v44 = vadd.f32 %v1987_v43, %v1981_v36 }
0x2771   :  { %v2008_v48 = vpop.permute.xlu1 %2007 }
0x2772   :  { %v2321_v45 = vmul.f32 -1.442695, %v1989_v44 }
0x2774   :  { %2607 = vpow2.f32 %v2321_v45 }
0x2775   :  { %v1998_v53 = vpop.permute.xlu1 %1997 }
0x2776   :  { %v2000_v54 = vadd.f32 %v1998_v53, %v1981_v36 }
0x2778   :  { %v2322_v55 = vmul.f32 -1.442695, %v2000_v54 }
0x2781   :  { %v2608_v46 = vpop.eup %2607 }
0x2782   :  { %v1993_v15 = vadd.f32 1.0, %v2608_v46 }
0x2784   :  { %2609 = vrcp.f32 %v1993_v15 }
0x2791   :  { %v2610_v47 = vpop.eup %2609 }
0x2792   :  { %v2010_v49 = vmul.f32 %v2610_v47, %v2008_v48 }
0x2794   :  { %2012 = vrot.lane.b32.xlu0 %v2010_v49, %s2764_s0 }
0x2806   :  { %v2013_v50 = vpop.permute.xlu0 %2012 }
0x2807   :  { %v2015_v51 = vadd.f32 %v2013_v50, %v1981_v36 }
0x2809   :  { %2611 = vtanh.f32 %v2015_v51 }
0x280a   :  { %2613 = vpow2.f32 %v2322_v55 }
0x2816   :  { %v2612_v52 = vpop.eup %2611 }
0x2817   :  { %2019 = vrot.lane.b32.xlu0 %v2612_v52, %s2767_s4  ;;  %v2614_v56 = vpop.eup %2613 }
0x2818   :  { %v2004_v57 = vadd.f32 1.0, %v2614_v56 }
0x281a   :  { %2615 = vrcp.f32 %v2004_v57 }
0x2827   :  { %v2616_v58 = vpop.eup %2615 }
0x2828   :  { %v2017_v59 = vsub.f32 1.0, %v2616_v58  ;;  %v2023_v61 = vmul.f32 %v2616_v58, %v3234_v9 }
0x2889   :  { %v2020_v18 = vpop.permute.xlu0 %2019 }
0x288a   :  { %v2022_v60 = vmul.f32 %v2020_v18, %v2017_v59 }
0x288c   :  { %v3247_v62 = vadd.f32 %v2023_v61, %v2022_v60 }
0x288e   :  { %2026 = vrot.lane.b32.xlu1 %v3247_v62, %s2767_s4  ;;  %v2141_v63 = vrot.slane %v3247_v62, 6 }
0x2900   :  { %v2027_v1 = vpop.permute.xlu1 %2026 }
0x2901   :  { %2323 = vmatmul.mubr.msk.f32.vlgmr.msra.gmra.mxu0 %vm245_vm3, %v2027_v1 }
0x29c1   :  { %v2096_v5 = vpop.f32.mrf.mxu0 }
0x29c2   :  { %v2097_v6 = vadd.f32 %v2096_v5, %v3115_v38 }
0x29c3   :  { %v2098_v10 = vpop.f32.mrf.mxu0 }
0x29c4   :  { %v2099_v11 = vadd.f32 %v2098_v10, %v3117_v39  ;;  %2102 = vrot.lane.b32.xlu0 %v2097_v6, %s2766_s15 }
0x29c6   :  { %2123 = vrot.lane.b32.xlu1 %v2099_v11, %s2767_s4 }
0x29ca   :  { %2113 = vrot.lane.b32.xlu1 %v2099_v11, %s2766_s15 }
0x2a36   :  { %v2103_v12 = vpop.permute.xlu0 %2102 }
0x2a37   :  { %v2105_v13 = vadd.f32 %v2103_v12, %v2097_v6 }
0x2a38   :  { %v2124_v29 = vpop.permute.xlu1 %2123 }
0x2a39   :  { %v2324_v25 = vmul.f32 -1.442695, %v2105_v13 }
0x2a3b   :  { %2617 = vpow2.f32 %v2324_v25 }
0x2a3c   :  { %v2114_v37 = vpop.permute.xlu1 %2113 }
0x2a3d   :  { %v2116_v24 = vadd.f32 %v2114_v37, %v2097_v6 }
0x2a3f   :  { %v2325_v31 = vmul.f32 -1.442695, %v2116_v24 }
0x2a48   :  { %v2618_v0 = vpop.eup %2617 }
0x2a49   :  { %v2109_v26 = vadd.f32 1.0, %v2618_v0 }
0x2a4b   :  { %2619 = vrcp.f32 %v2109_v26 }
0x2a58   :  { %v2620_v28 = vpop.eup %2619 }
0x2a59   :  { %v2126_v2 = vmul.f32 %v2620_v28, %v2124_v29 }
0x2a5b   :  { %2128 = vrot.lane.b32.xlu0 %v2126_v2, %s2764_s0 }
0x2acd   :  { %v2129_v38 = vpop.permute.xlu0 %2128 }
0x2ace   :  { %v2131_v39 = vadd.f32 %v2129_v38, %v2097_v6 }
0x2ad0   :  { %2621 = vtanh.f32 %v2131_v39 }
0x2ad1   :  { %2623 = vpow2.f32 %v2325_v31 }
0x2add   :  { %v2622_v22 = vpop.eup %2621 }
0x2ade   :  { %2135 = vrot.lane.b32.xlu0 %v2622_v22, %s2767_s4  ;;  %v2624_v4 = vpop.eup %2623 }
0x2adf   :  { %v2120_v32 = vadd.f32 1.0, %v2624_v4 }
0x2ae1   :  { %2625 = vrcp.f32 %v2120_v32 }
0x2ae2   :  { %2176 = vrot.lane.b32.xlu0 %v2160_v41, %s2767_s4 }
0x2aee   :  { %v2626_v7 = vpop.eup %2625 }
0x2aef   :  { %v2133_v33 = vsub.f32 1.0, %v2626_v7  ;;  %v2139_v20 = vmul.f32 %v2626_v7, %v3247_v62 }
0x2b50   :  { %v2136_v34 = vpop.permute.xlu0 %2135 }
0x2b51   :  { %v2138_v35 = vmul.f32 %v2136_v34, %v2133_v33 }
0x2b53   :  { %v2140_v36 = vadd.f32 %v2139_v20, %v2138_v35 }
0x2b54   :  { %v2177_v15 = vpop.permute.xlu0 %2176 }
0x2b55   :  { %v2154_v43 = vsel %vm2153_vm5, %v2140_v36, %v2141_v63 }
0x2b56   :  { %v2155_v44 = vsel %vm116_vm1, %v2154_v43, %v2143_v40 }
0x2b57   :  { %v2157_v45 = vsel %vm2156_vm6, %v2155_v44, %v2145_v42 }
0x2b58   :  { %2174 = vrot.lane.b32.xlu1 %v2157_v45, %s2767_s4 }
0x2bca   :  { %v2175_v46 = vpop.permute.xlu1 %2174 }
0x2bcb   :  { %2482 = vmatprep.mubr.msk.f32.mxu1 %vm245_vm3, %v2175_v46 }
0x2bcc   :  { %2483 = vmatmul.mubr.msk.f32.vlgmr.msra.gmra.mxu1 %vm245_vm3, %v2177_v15 }
0x2bcd   :  { %2738 = shalt.err (!%p2735_p1)
}
0x2bce   :  { %2271 = dma.vmem_to_hbm [thread:$0]  %s2269_s3, 32, %s3309_s11, [#allocation4]   ;;  %v2326_v8 = vld [vmem:[#allocation10] ss:$0 sm:$0xff]  ;;  %vm2257_vm7 = vcmask 130048  }
0x2c8c   :  { %v2484_v9 = vpop.f32.mrf.mxu1 }
0x2c8d   :  { %v2254_v47 = vadd.f32 %v2484_v9, %v2326_v8 }
0x2c8e   :  { %v2248_v48 = vpop.f32.mrf.mxu1 }
0x2c8f   :  { %2259 = vst.msk [vmem:[%s3308_s10 + $0x8] sm:$0xff] %vm2257_vm7, %v2254_v47  ;;  %v2249_v49 = vadd.f32 %v2326_v8, %v2248_v48 }
0x2c91   :  { %2258 = vst.msk [vmem:[%s3308_s10] sm:$0xff] %vm2257_vm7, %v2249_v49 }
0x2c92   :  { %2753 = dma.done.wait [#allocation4], 32  }
0x2c93   :  { %2754 = vsyncadd [#allocation4], 4294967264 }
0x2c94   :  { %2277 = vsyncpa [#allocation3], 1 }
0x2c95   :  { %2278 = vsyncpa [#allocation6], 1 }
0x2c96   :  { %2279 = vsyncpa [#allocation9], 1 }
0x2c97   :  { %2280 = vsyncpa [#allocation4], 1 }

</bundles_post_ra>
